<compile_context>
chip_gen: v7x
topology: tpu7x:2x2x1
jax: 0.10.0
libtpu: 0.0.40
codegen_flags: <defaults>
</compile_context>

<pallas_src>
import functools

import numpy as np

import jax
import jax.numpy as jnp
from jax.experimental import pallas as pl
from jax.experimental.pallas import tpu as pltpu

NP = 128          # lane-padded width of conv outputs / fc intermediates
KH = 5            # conv kernel height (both convs)
CONV1_HOP = 14    # pooled output rows of conv1
CONV2_HOP = 5     # pooled output rows of conv2


# ------------------------------------------------------------------ kernels --
def _make_conv_pool_kernel(np_half):
    """Fused conv (kh folded into K) + 2x2 max-pool + bias + ReLU over a batch
    tile.

    Refs:
      x_ref : (2, tb*HOp, KH*L)   bf16  row-windowed input, axis0 = row parity
      w_ref : (KH*L, 2*np_half)   bf16  block-Toeplitz weights, col parity in N
      b_ref : (1, np_half)        f32   bias tiled over pooled output columns
      o_ref : (tb*HOp, np_half)   bf16  pooled activations, lanes = (jp, o)+pad
    """
    def kernel(x_ref, w_ref, b_ref, o_ref):
        w = w_ref[...]
        y0 = jnp.dot(x_ref[0], w, preferred_element_type=jnp.float32)
        y1 = jnp.dot(x_ref[1], w, preferred_element_type=jnp.float32)
        y = jnp.maximum(y0, y1)                              # pool over row parity
        y = jnp.maximum(y[:, :np_half], y[:, np_half:])      # pool over col parity
        o_ref[...] = jnp.maximum(y + b_ref[...], 0.0).astype(o_ref.dtype)
    return kernel


def _make_conv2_fc_head_kernel(tb, np_half, hop):
    """conv2 + pool fused with fc1+ReLU -> fc2+ReLU -> fc3 -> log-softmax.
    x_ref rows are ordered (ip2, t) so the fc1 contraction over the 5 spatial
    rows is 5 aligned contiguous row-block matmuls accumulated in f32."""
    def kernel(x_ref, wc_ref, bc_ref, w1_ref, b1_ref, w2_ref, b2_ref,
               w3_ref, b3_ref, o_ref):
        wc = wc_ref[...]
        y0 = jnp.dot(x_ref[0], wc, preferred_element_type=jnp.float32)
        y1 = jnp.dot(x_ref[1], wc, preferred_element_type=jnp.float32)
        y = jnp.maximum(y0, y1)
        y = jnp.maximum(y[:, :np_half], y[:, np_half:])
        a = jnp.maximum(y + bc_ref[...], 0.0).astype(jnp.bfloat16)  # (hop*tb, NP)

        acc = jnp.dot(a[0:tb], w1_ref[0], preferred_element_type=jnp.float32)
        for ip in range(1, hop):
            acc = acc + jnp.dot(a[ip * tb:(ip + 1) * tb], w1_ref[ip],
                                preferred_element_type=jnp.float32)
        h = jnp.maximum(acc + b1_ref[...], 0.0).astype(jnp.bfloat16)
        h = jnp.maximum(
            jnp.dot(h, w2_ref[...], preferred_element_type=jnp.float32)
            + b2_ref[...], 0.0).astype(jnp.bfloat16)
        logits = (jnp.dot(h, w3_ref[...], preferred_element_type=jnp.float32)
                  + b3_ref[...])                    # padded lanes ~ -1e30
        m = jnp.max(logits, axis=-1, keepdims=True)
        s = logits - m
        lse = jnp.log(jnp.sum(jnp.exp(s), axis=-1, keepdims=True))
        o_ref[...] = s - lse
    return kernel


# ----------------------------------------------------------- layer wrappers --
def conv_pool_layer(xw, wt, bias, *, tb, hop, np_half):
    """xw: (2, Bp*hop, KH*L) row-windowed input; returns (Bp*hop, np_half)."""
    nrows, k = xw.shape[1], xw.shape[2]
    nblocks = nrows // (tb * hop)
    return pl.pallas_call(
        _make_conv_pool_kernel(np_half),
        out_shape=jax.ShapeDtypeStruct((nrows, np_half), jnp.bfloat16),
        grid=(nblocks,),
        in_specs=[
            pl.BlockSpec((2, tb * hop, k), lambda i: (0, i, 0)),
            pl.BlockSpec(wt.shape, lambda i: (0, 0)),
            pl.BlockSpec(bias.shape, lambda i: (0, 0)),
        ],
        out_specs=pl.BlockSpec((tb * hop, np_half), lambda i: (i, 0)),
        compiler_params=pltpu.CompilerParams(
            dimension_semantics=("parallel",)),
    )(xw, wt, bias)


def conv2_fc_head(xw, p, *, tb, hop, np_half, bp):
    """xw: (2, Bp*hop, KH*NP) conv2 windowed input with rows ordered
    (batch-block, ip2, t).  Returns (Bp, np_half) f32 log-probs (lane-padded)."""
    k = xw.shape[2]
    nblocks = bp // tb
    return pl.pallas_call(
        _make_conv2_fc_head_kernel(tb, np_half, hop),
        out_shape=jax.ShapeDtypeStruct((bp, np_half), jnp.float32),
        grid=(nblocks,),
        in_specs=[
            pl.BlockSpec((2, hop * tb, k), lambda i: (0, i, 0)),
            pl.BlockSpec(p["conv2_wt"].shape, lambda i: (0, 0)),
            pl.BlockSpec(p["conv2_b"].shape, lambda i: (0, 0)),
            pl.BlockSpec(p["fc1_w"].shape, lambda i: (0, 0, 0)),
            pl.BlockSpec(p["fc1_b"].shape, lambda i: (0, 0)),
            pl.BlockSpec(p["fc2_w"].shape, lambda i: (0, 0)),
            pl.BlockSpec(p["fc2_b"].shape, lambda i: (0, 0)),
            pl.BlockSpec(p["fc3_w"].shape, lambda i: (0, 0)),
            pl.BlockSpec(p["fc3_b"].shape, lambda i: (0, 0)),
        ],
        out_specs=pl.BlockSpec((tb, np_half), lambda i: (i, 0)),
        compiler_params=pltpu.CompilerParams(
            dimension_semantics=("parallel",)),
    )(xw, p["conv2_wt"], p["conv2_b"], p["fc1_w"], p["fc1_b"],
      p["fc2_w"], p["fc2_b"], p["fc3_w"], p["fc3_b"])


# ------------------------------------------------------------------- params --
def init_params(key, num_classes=10):
    """Raw parameters in the PyTorch layout / init convention."""
    def uniform(k, shape, fan_in):
        bound = 1.0 / float(fan_in) ** 0.5
        return jax.random.uniform(k, shape, jnp.float32, -bound, bound)

    ks = jax.random.split(key, 10)
    return {
        "conv1_w": uniform(ks[0], (6, 3, 5, 5), 3 * 5 * 5),
        "conv1_b": uniform(ks[1], (6,), 3 * 5 * 5),
        "conv2_w": uniform(ks[2], (16, 6, 5, 5), 6 * 5 * 5),
        "conv2_b": uniform(ks[3], (16,), 6 * 5 * 5),
        "fc1_w": uniform(ks[4], (120, 16 * 5 * 5), 16 * 5 * 5),
        "fc1_b": uniform(ks[5], (120,), 16 * 5 * 5),
        "fc2_w": uniform(ks[6], (84, 120), 120),
        "fc2_b": uniform(ks[7], (84,), 120),
        "fc3_w": uniform(ks[8], (num_classes, 84), 84),
        "fc3_b": uniform(ks[9], (num_classes,), 84),
    }


def _prep_conv_toeplitz(w, b, *, w_in, row_lanes):
    """kh-folded, pool-phase block-Toeplitz weights, lane-padded to 2*NP cols:
       wt[kh*row_lanes + (2*jp+dj+kw)*C + c, dj*NP + jp*O + o] = w[o,c,kh,kw].
    `row_lanes` is the lane width of one input row (raw W*C for conv1, padded
    NP for conv2 whose input is the lane-padded conv1 output)."""
    o_ch, c_ch, kh_sz, kw_sz = w.shape
    wo = w_in - kw_sz + 1
    wop = wo // 2
    wt = np.zeros((kh_sz * row_lanes, 2 * NP), np.float32)
    wn = np.asarray(w, np.float32)
    for dj in range(2):
        for kh in range(kh_sz):
            for kw in range(kw_sz):
                blk = wn[:, :, kh, kw].T                     # (C, O)
                for jp in range(wop):
                    r0 = kh * row_lanes + (2 * jp + dj + kw) * c_ch
                    c0 = dj * NP + jp * o_ch
                    wt[r0:r0 + c_ch, c0:c0 + o_ch] = blk
    bias = np.zeros((1, NP), np.float32)
    bias[0, :wop * o_ch] = np.tile(np.asarray(b, np.float32), wop)
    return jnp.asarray(wt, jnp.bfloat16), jnp.asarray(bias, jnp.float32)


def _prep_fc_head(raw, num_classes):
    assert num_classes <= NP
    # fc1: columns permuted from PyTorch (c, h, w) flatten order to the
    # kernel's (ip2 row-block, lane = jp2*16 + c) layout, padded 120 -> 128.
    fc1_w = np.asarray(raw["fc1_w"], np.float32)             # (120, 400)
    w1 = np.zeros((CONV2_HOP, NP, NP), np.float32)
    for ip in range(CONV2_HOP):
        for jp in range(5):
            for c in range(16):
                w1[ip, jp * 16 + c, :120] = fc1_w[:, c * 25 + ip * 5 + jp]
    b1 = np.zeros((1, NP), np.float32)
    b1[0, :120] = np.asarray(raw["fc1_b"], np.float32)

    w2 = np.zeros((NP, NP), np.float32)
    w2[:120, :84] = np.asarray(raw["fc2_w"], np.float32).T
    b2 = np.zeros((1, NP), np.float32)
    b2[0, :84] = np.asarray(raw["fc2_b"], np.float32)

    w3 = np.zeros((NP, NP), np.float32)
    w3[:84, :num_classes] = np.asarray(raw["fc3_w"], np.float32).T
    b3 = np.full((1, NP), -1e30, np.float32)   # padded logits -> ~-inf (safe)
    b3[0, :num_classes] = np.asarray(raw["fc3_b"], np.float32)

    return (jnp.asarray(w1, jnp.bfloat16), jnp.asarray(b1, jnp.float32),
            jnp.asarray(w2, jnp.bfloat16), jnp.asarray(b2, jnp.float32),
            jnp.asarray(w3, jnp.bfloat16), jnp.asarray(b3, jnp.float32))


def prepare_params(raw):
    """One-time weight prep (lane-padded Toeplitz conv weights, permuted /
    padded fc weights, bf16 MXU operands, f32 biases)."""
    num_classes = raw["fc3_w"].shape[0]
    c1w, c1b = _prep_conv_toeplitz(raw["conv1_w"], raw["conv1_b"],
                                   w_in=32, row_lanes=32 * 3)
    c2w, c2b = _prep_conv_toeplitz(raw["conv2_w"], raw["conv2_b"],
                                   w_in=14, row_lanes=NP)
    w1, b1, w2, b2, w3, b3 = _prep_fc_head(raw, num_classes)
    return {
        "conv1_wt": c1w, "conv1_b": c1b,
        "conv2_wt": c2w, "conv2_b": c2b,
        "fc1_w": w1, "fc1_b": b1,
        "fc2_w": w2, "fc2_b": b2,
        "fc3_w": w3, "fc3_b": b3,
    }


# ----------------------------------------------------------------- JAX glue --
def _pick_tiling(B):
    """Batch tile and padded batch.  Keep >=2 grid steps (v7x second TC +
    input pipelining) while bounding padding; grow tb with the batch."""
    for tb in (64, 32, 16, 8):
        if B >= 2 * tb:
            return tb, int(pl.cdiv(B, tb)) * tb
    return 8, 16


def _row_windows(x_rows, n_out, kh):
    """x_rows (B, H, L) -> (2, B*n_out, kh*L):
       out[di, b*n_out+ip, k*L+l] = x_rows[b, 2*ip+di+k, l]."""
    b, _, l = x_rows.shape
    outs = []
    for di in range(2):
        cols = [x_rows[:, di + k::2, :][:, :n_out, :] for k in range(kh)]
        outs.append(jnp.concatenate(cols, axis=-1).reshape(b * n_out, kh * l))
    return jnp.stack(outs, axis=0)


def _row_windows_blocked(x_rows, n_out, kh, tb):
    """Same as _row_windows but rows ordered (batch-block, ip, t-in-block) so
    the fused conv2+fc kernel can slice contiguous per-ip row blocks."""
    b, _, l = x_rows.shape
    nb = b // tb
    outs = []
    for di in range(2):
        cols = [x_rows[:, di + k::2, :][:, :n_out, :] for k in range(kh)]
        w = jnp.concatenate(cols, axis=-1)                   # (b, n_out, kh*l)
        w = w.reshape(nb, tb, n_out, kh * l)
        w = jnp.transpose(w, (0, 2, 1, 3))                   # (nb, n_out, tb, .)
        outs.append(w.reshape(b * n_out, kh * l))
    return jnp.stack(outs, axis=0)


# ------------------------------------------------------------------ forward --
@functools.partial(jax.jit, static_argnames=("num_classes",))
def cnn_cifar_forward(prepped, x_nchw, num_classes=10):
    x = jnp.transpose(x_nchw.astype(jnp.float32), (0, 2, 3, 1))      # NHWC
    B, H, W, C = x.shape
    tb, Bp = _pick_tiling(B)
    x2 = x.reshape(B, H, W * C).astype(jnp.bfloat16)
    if Bp != B:
        x2 = jnp.pad(x2, ((0, Bp - B), (0, 0), (0, 0)))

    # conv1 + pool: (2, Bp*14, 480) -> (Bp*14, 128)
    xw1 = _row_windows(x2, CONV1_HOP, KH)
    h1 = conv_pool_layer(xw1, prepped["conv1_wt"], prepped["conv1_b"],
                         tb=tb, hop=CONV1_HOP, np_half=NP)
    h1 = h1.reshape(Bp, CONV1_HOP, NP)

    # conv2 + pool + fc1 + fc2 + fc3 + log-softmax (single fused kernel)
    xw2 = _row_windows_blocked(h1, CONV2_HOP, KH, tb)        # (2, Bp*5, 640)
    out = conv2_fc_head(xw2, prepped, tb=tb, hop=CONV2_HOP, np_half=NP, bp=Bp)
    return out[:B, :num_classes]


# ---------------------------------------------------------------- reference --
def reference_forward(raw, x_nchw):
    """Plain-JAX reference matching the PyTorch module (bf16 matmul inputs,
    f32 accumulation -- same precision recipe as the kernels)."""
    x = jnp.transpose(x_nchw.astype(jnp.float32), (0, 2, 3, 1)).astype(jnp.bfloat16)

    def conv_relu(xin, w, b):
        k = w.shape[-1]
        bsz, h, wd, c = xin.shape
        ho, wo = h - k + 1, wd - k + 1
        cols = [xin[:, i:i + ho, j:j + wo, :] for i in range(k) for j in range(k)]
        p = jnp.concatenate(cols, axis=-1).reshape(bsz * ho * wo, k * k * c)
        w2 = jnp.transpose(w, (2, 3, 1, 0)).reshape(k * k * c, -1).astype(jnp.bfloat16)
        y = jnp.dot(p, w2, preferred_element_type=jnp.float32) + b.reshape(1, -1)
        return jnp.maximum(y, 0.0).reshape(bsz, ho, wo, -1)

    def pool(y):
        return jnp.maximum(jnp.maximum(y[:, 0::2, 0::2, :], y[:, 0::2, 1::2, :]),
                           jnp.maximum(y[:, 1::2, 0::2, :], y[:, 1::2, 1::2, :]))

    y = pool(conv_relu(x, raw["conv1_w"], raw["conv1_b"])).astype(jnp.bfloat16)
    y = pool(conv_relu(y, raw["conv2_w"], raw["conv2_b"])).astype(jnp.bfloat16)
    b = y.shape[0]
    flat = jnp.transpose(y, (0, 3, 1, 2)).reshape(b, -1).astype(jnp.bfloat16)
    h = jnp.maximum(jnp.dot(flat, raw["fc1_w"].T.astype(jnp.bfloat16),
                            preferred_element_type=jnp.float32) + raw["fc1_b"], 0.0)
    h = jnp.maximum(jnp.dot(h.astype(jnp.bfloat16), raw["fc2_w"].T.astype(jnp.bfloat16),
                            preferred_element_type=jnp.float32) + raw["fc2_b"], 0.0)
    logits = jnp.dot(h.astype(jnp.bfloat16), raw["fc3_w"].T.astype(jnp.bfloat16),
                     preferred_element_type=jnp.float32) + raw["fc3_b"]
    return jax.nn.log_softmax(logits, axis=-1)


if __name__ == "__main__":
    key = jax.random.PRNGKey(0)
    pkey, xkey = jax.random.split(key)
    num_classes = 10
    raw = init_params(pkey, num_classes=num_classes)
    prepped = prepare_params(raw)
    # CIFAR-shaped input (32x32 required so the 16*5*5 flatten matches), B=2.
    x = jax.random.normal(xkey, (2, 3, 32, 32), dtype=jnp.float32)

    out = jax.block_until_ready(
        cnn_cifar_forward(prepped, x, num_classes=num_classes))

    assert out.shape == (2, num_classes), out.shape
    assert bool(jnp.all(jnp.isfinite(out)))
    row_sums = jnp.exp(out).sum(axis=1)
    assert bool(jnp.all(jnp.abs(row_sums - 1.0) < 1e-4)), row_sums

    ref = reference_forward(raw, x)
    max_err = float(jnp.max(jnp.abs(out - ref)))
    assert max_err < 2e-2, max_err
    print("KERNEL_OK")
</pallas_src>

<mosaic_0001>
module attributes {stable_mosaic.version = 11 : i64} {
  func.func @kernel(%arg0: i32, %arg1: memref<2x112x480xbf16, #tpu.memory_space<vmem>>, %arg2: memref<480x256xbf16, #tpu.memory_space<vmem>>, %arg3: memref<1x128xf32, #tpu.memory_space<vmem>>, %arg4: memref<112x128xbf16, #tpu.memory_space<vmem>>) attributes {dimension_semantics = [#tpu.dimension_semantics<parallel>], iteration_bounds = array<i64: 2>, scalar_prefetch = 0 : i64, scratch_operands = 0 : i64, tpu.core_type = #tpu.core_type<tc>, window_params = [{transform_indices = @transform_0, window_bounds = array<i64: 2, 112, 480>}, {pipeline_mode = #tpu.pipeline_mode<synchronous>, transform_indices = @transform_1, window_bounds = array<i64: 480, 256>}, {pipeline_mode = #tpu.pipeline_mode<synchronous>, transform_indices = @transform_2, window_bounds = array<i64: 1, 128>}, {transform_indices = @transform_3, window_bounds = array<i64: 112, 128>}]} {
    %c0 = arith.constant 0 : index
    %c0_0 = arith.constant 0 : index
    %0 = vector.load %arg2[%c0, %c0_0] : memref<480x256xbf16, #tpu.memory_space<vmem>>, vector<480x256xbf16>
    %c0_1 = arith.constant 0 : index
    %c0_2 = arith.constant 0 : index
    %c0_3 = arith.constant 0 : index
    %1 = vector.load %arg1[%c0_1, %c0_2, %c0_3] : memref<2x112x480xbf16, #tpu.memory_space<vmem>>, vector<1x112x480xbf16>
    %2 = vector.shape_cast %1 : vector<1x112x480xbf16> to vector<112x480xbf16>
    %cst = arith.constant dense<0.000000e+00> : vector<112x256xf32>
    %3 = tpu.matmul %2, %0, %cst {dimension_numbers = #tpu.dot_dimension_numbers<[1], [0], [0], [1], [0, 0, 1, 1], [], []>} : vector<112x480xbf16>, vector<480x256xbf16>, vector<112x256xf32> -> vector<112x256xf32>
    %c1 = arith.constant 1 : index
    %c0_4 = arith.constant 0 : index
    %c0_5 = arith.constant 0 : index
    %4 = vector.load %arg1[%c1, %c0_4, %c0_5] : memref<2x112x480xbf16, #tpu.memory_space<vmem>>, vector<1x112x480xbf16>
    %5 = vector.shape_cast %4 : vector<1x112x480xbf16> to vector<112x480xbf16>
    %cst_6 = arith.constant dense<0.000000e+00> : vector<112x256xf32>
    %6 = tpu.matmul %5, %0, %cst_6 {dimension_numbers = #tpu.dot_dimension_numbers<[1], [0], [0], [1], [0, 0, 1, 1], [], []>} : vector<112x480xbf16>, vector<480x256xbf16>, vector<112x256xf32> -> vector<112x256xf32>
    %7 = arith.maximumf %3, %6 : vector<112x256xf32>
    %8 = vector.extract_strided_slice %7 {offsets = [0, 0], sizes = [112, 128], strides = [1, 1]} : vector<112x256xf32> to vector<112x128xf32>
    %9 = vector.extract_strided_slice %7 {offsets = [0, 128], sizes = [112, 128], strides = [1, 1]} : vector<112x256xf32> to vector<112x128xf32>
    %10 = arith.maximumf %8, %9 : vector<112x128xf32>
    %c0_7 = arith.constant 0 : index
    %c0_8 = arith.constant 0 : index
    %11 = vector.load %arg3[%c0_7, %c0_8] : memref<1x128xf32, #tpu.memory_space<vmem>>, vector<1x128xf32>
    %12 = vector.broadcast %11 : vector<1x128xf32> to vector<112x128xf32>
    %13 = arith.addf %10, %12 : vector<112x128xf32>
    %cst_9 = arith.constant 0.000000e+00 : f32
    %14 = vector.broadcast %cst_9 : f32 to vector<112x128xf32>
    %15 = arith.maximumf %13, %14 : vector<112x128xf32>
    %16 = arith.truncf %15 : vector<112x128xf32> to vector<112x128xbf16>
    %c0_10 = arith.constant 0 : index
    %c0_11 = arith.constant 0 : index
    %17 = vector.load %arg4[%c0_10, %c0_11] : memref<112x128xbf16, #tpu.memory_space<vmem>>, vector<112x128xbf16>
    tpu.vector_store %arg4[%c0_10, %c0_11], %16 {strides = array<i32>} : memref<112x128xbf16, #tpu.memory_space<vmem>>, vector<112x128xbf16>,
    return
  }
  func.func @transform_0(%arg0: i32) -> (i32, i32, i32) {
    %c0_i32 = arith.constant 0 : i32
    %c0_i32_0 = arith.constant 0 : i32
    %c0_i32_1 = arith.constant 0 : i32
    return %c0_i32, %arg0, %c0_i32_0 : i32, i32, i32
  }
  func.func @transform_1(%arg0: i32) -> (i32, i32) {
    %c0_i32 = arith.constant 0 : i32
    %c0_i32_0 = arith.constant 0 : i32
    %c0_i32_1 = arith.constant 0 : i32
    return %c0_i32, %c0_i32_0 : i32, i32
  }
  func.func @transform_2(%arg0: i32) -> (i32, i32) {
    %c0_i32 = arith.constant 0 : i32
    %c0_i32_0 = arith.constant 0 : i32
    %c0_i32_1 = arith.constant 0 : i32
    return %c0_i32, %c0_i32_0 : i32, i32
  }
  func.func @transform_3(%arg0: i32) -> (i32, i32) {
    %c0_i32 = arith.constant 0 : i32
    %c0_i32_0 = arith.constant 0 : i32
    return %arg0, %c0_i32 : i32, i32
  }
}

module attributes {stable_mosaic.version = 11 : i64} {
  func.func @kernel(%arg0: i32, %arg1: memref<2x40x640xbf16, #tpu.memory_space<vmem>>, %arg2: memref<640x256xbf16, #tpu.memory_space<vmem>>, %arg3: memref<1x128xf32, #tpu.memory_space<vmem>>, %arg4: memref<5x128x128xbf16, #tpu.memory_space<vmem>>, %arg5: memref<1x128xf32, #tpu.memory_space<vmem>>, %arg6: memref<128x128xbf16, #tpu.memory_space<vmem>>, %arg7: memref<1x128xf32, #tpu.memory_space<vmem>>, %arg8: memref<128x128xbf16, #tpu.memory_space<vmem>>, %arg9: memref<1x128xf32, #tpu.memory_space<vmem>>, %arg10: memref<8x128xf32, #tpu.memory_space<vmem>>) attributes {dimension_semantics = [#tpu.dimension_semantics<parallel>], iteration_bounds = array<i64: 2>, scalar_prefetch = 0 : i64, scratch_operands = 0 : i64, tpu.core_type = #tpu.core_type<tc>, window_params = [{transform_indices = @transform_0, window_bounds = array<i64: 2, 40, 640>}, {pipeline_mode = #tpu.pipeline_mode<synchronous>, transform_indices = @transform_1, window_bounds = array<i64: 640, 256>}, {pipeline_mode = #tpu.pipeline_mode<synchronous>, transform_indices = @transform_2, window_bounds = array<i64: 1, 128>}, {pipeline_mode = #tpu.pipeline_mode<synchronous>, transform_indices = @transform_3, window_bounds = array<i64: 5, 128, 128>}, {pipeline_mode = #tpu.pipeline_mode<synchronous>, transform_indices = @transform_4, window_bounds = array<i64: 1, 128>}, {pipeline_mode = #tpu.pipeline_mode<synchronous>, transform_indices = @transform_5, window_bounds = array<i64: 128, 128>}, {pipeline_mode = #tpu.pipeline_mode<synchronous>, transform_indices = @transform_6, window_bounds = array<i64: 1, 128>}, {pipeline_mode = #tpu.pipeline_mode<synchronous>, transform_indices = @transform_7, window_bounds = array<i64: 128, 128>}, {pipeline_mode = #tpu.pipeline_mode<synchronous>, transform_indices = @transform_8, window_bounds = array<i64: 1, 128>}, {transform_indices = @transform_9, window_bounds = array<i64: 8, 128>}]} {
    %c0 = arith.constant 0 : index
    %c0_0 = arith.constant 0 : index
    %0 = vector.load %arg2[%c0, %c0_0] : memref<640x256xbf16, #tpu.memory_space<vmem>>, vector<640x256xbf16>
    %c0_1 = arith.constant 0 : index
    %c0_2 = arith.constant 0 : index
    %c0_3 = arith.constant 0 : index
    %1 = vector.load %arg1[%c0_1, %c0_2, %c0_3] : memref<2x40x640xbf16, #tpu.memory_space<vmem>>, vector<1x40x640xbf16>
    %2 = vector.shape_cast %1 : vector<1x40x640xbf16> to vector<40x640xbf16>
    %cst = arith.constant dense<0.000000e+00> : vector<40x256xf32>
    %3 = tpu.matmul %2, %0, %cst {dimension_numbers = #tpu.dot_dimension_numbers<[1], [0], [0], [1], [0, 0, 1, 1], [], []>} : vector<40x640xbf16>, vector<640x256xbf16>, vector<40x256xf32> -> vector<40x256xf32>
    %c1 = arith.constant 1 : index
    %c0_4 = arith.constant 0 : index
    %c0_5 = arith.constant 0 : index
    %4 = vector.load %arg1[%c1, %c0_4, %c0_5] : memref<2x40x640xbf16, #tpu.memory_space<vmem>>, vector<1x40x640xbf16>
    %5 = vector.shape_cast %4 : vector<1x40x640xbf16> to vector<40x640xbf16>
    %cst_6 = arith.constant dense<0.000000e+00> : vector<40x256xf32>
    %6 = tpu.matmul %5, %0, %cst_6 {dimension_numbers = #tpu.dot_dimension_numbers<[1], [0], [0], [1], [0, 0, 1, 1], [], []>} : vector<40x640xbf16>, vector<640x256xbf16>, vector<40x256xf32> -> vector<40x256xf32>
    %7 = arith.maximumf %3, %6 : vector<40x256xf32>
    %8 = vector.extract_strided_slice %7 {offsets = [0, 0], sizes = [40, 128], strides = [1, 1]} : vector<40x256xf32> to vector<40x128xf32>
    %9 = vector.extract_strided_slice %7 {offsets = [0, 128], sizes = [40, 128], strides = [1, 1]} : vector<40x256xf32> to vector<40x128xf32>
    %10 = arith.maximumf %8, %9 : vector<40x128xf32>
    %c0_7 = arith.constant 0 : index
    %c0_8 = arith.constant 0 : index
    %11 = vector.load %arg3[%c0_7, %c0_8] : memref<1x128xf32, #tpu.memory_space<vmem>>, vector<1x128xf32>
    %12 = vector.broadcast %11 : vector<1x128xf32> to vector<40x128xf32>
    %13 = arith.addf %10, %12 : vector<40x128xf32>
    %cst_9 = arith.constant 0.000000e+00 : f32
    %14 = vector.broadcast %cst_9 : f32 to vector<40x128xf32>
    %15 = arith.maximumf %13, %14 : vector<40x128xf32>
    %16 = arith.truncf %15 : vector<40x128xf32> to vector<40x128xbf16>
    %17 = vector.extract_strided_slice %16 {offsets = [0, 0], sizes = [8, 128], strides = [1, 1]} : vector<40x128xbf16> to vector<8x128xbf16>
    %c0_10 = arith.constant 0 : index
    %c0_11 = arith.constant 0 : index
    %c0_12 = arith.constant 0 : index
    %18 = vector.load %arg4[%c0_10, %c0_11, %c0_12] : memref<5x128x128xbf16, #tpu.memory_space<vmem>>, vector<1x128x128xbf16>
    %19 = vector.shape_cast %18 : vector<1x128x128xbf16> to vector<128x128xbf16>
    %cst_13 = arith.constant dense<0.000000e+00> : vector<8x128xf32>
    %20 = tpu.matmul %17, %19, %cst_13 {dimension_numbers = #tpu.dot_dimension_numbers<[1], [0], [0], [1], [0, 0, 1, 1], [], []>} : vector<8x128xbf16>, vector<128x128xbf16>, vector<8x128xf32> -> vector<8x128xf32>
    %21 = vector.extract_strided_slice %16 {offsets = [8, 0], sizes = [8, 128], strides = [1, 1]} : vector<40x128xbf16> to vector<8x128xbf16>
    %c1_14 = arith.constant 1 : index
    %c0_15 = arith.constant 0 : index
    %c0_16 = arith.constant 0 : index
    %22 = vector.load %arg4[%c1_14, %c0_15, %c0_16] : memref<5x128x128xbf16, #tpu.memory_space<vmem>>, vector<1x128x128xbf16>
    %23 = vector.shape_cast %22 : vector<1x128x128xbf16> to vector<128x128xbf16>
    %cst_17 = arith.constant dense<0.000000e+00> : vector<8x128xf32>
    %24 = tpu.matmul %21, %23, %cst_17 {dimension_numbers = #tpu.dot_dimension_numbers<[1], [0], [0], [1], [0, 0, 1, 1], [], []>} : vector<8x128xbf16>, vector<128x128xbf16>, vector<8x128xf32> -> vector<8x128xf32>
    %25 = arith.addf %20, %24 : vector<8x128xf32>
    %26 = vector.extract_strided_slice %16 {offsets = [16, 0], sizes = [8, 128], strides = [1, 1]} : vector<40x128xbf16> to vector<8x128xbf16>
    %c2 = arith.constant 2 : index
    %c0_18 = arith.constant 0 : index
    %c0_19 = arith.constant 0 : index
    %27 = vector.load %arg4[%c2, %c0_18, %c0_19] : memref<5x128x128xbf16, #tpu.memory_space<vmem>>, vector<1x128x128xbf16>
    %28 = vector.shape_cast %27 : vector<1x128x128xbf16> to vector<128x128xbf16>
    %cst_20 = arith.constant dense<0.000000e+00> : vector<8x128xf32>
    %29 = tpu.matmul %26, %28, %cst_20 {dimension_numbers = #tpu.dot_dimension_numbers<[1], [0], [0], [1], [0, 0, 1, 1], [], []>} : vector<8x128xbf16>, vector<128x128xbf16>, vector<8x128xf32> -> vector<8x128xf32>
    %30 = arith.addf %25, %29 : vector<8x128xf32>
    %31 = vector.extract_strided_slice %16 {offsets = [24, 0], sizes = [8, 128], strides = [1, 1]} : vector<40x128xbf16> to vector<8x128xbf16>
    %c3 = arith.constant 3 : index
    %c0_21 = arith.constant 0 : index
    %c0_22 = arith.constant 0 : index
    %32 = vector.load %arg4[%c3, %c0_21, %c0_22] : memref<5x128x128xbf16, #tpu.memory_space<vmem>>, vector<1x128x128xbf16>
    %33 = vector.shape_cast %32 : vector<1x128x128xbf16> to vector<128x128xbf16>
    %cst_23 = arith.constant dense<0.000000e+00> : vector<8x128xf32>
    %34 = tpu.matmul %31, %33, %cst_23 {dimension_numbers = #tpu.dot_dimension_numbers<[1], [0], [0], [1], [0, 0, 1, 1], [], []>} : vector<8x128xbf16>, vector<128x128xbf16>, vector<8x128xf32> -> vector<8x128xf32>
    %35 = arith.addf %30, %34 : vector<8x128xf32>
    %36 = vector.extract_strided_slice %16 {offsets = [32, 0], sizes = [8, 128], strides = [1, 1]} : vector<40x128xbf16> to vector<8x128xbf16>
    %c4 = arith.constant 4 : index
    %c0_24 = arith.constant 0 : index
    %c0_25 = arith.constant 0 : index
    %37 = vector.load %arg4[%c4, %c0_24, %c0_25] : memref<5x128x128xbf16, #tpu.memory_space<vmem>>, vector<1x128x128xbf16>
    %38 = vector.shape_cast %37 : vector<1x128x128xbf16> to vector<128x128xbf16>
    %cst_26 = arith.constant dense<0.000000e+00> : vector<8x128xf32>
    %39 = tpu.matmul %36, %38, %cst_26 {dimension_numbers = #tpu.dot_dimension_numbers<[1], [0], [0], [1], [0, 0, 1, 1], [], []>} : vector<8x128xbf16>, vector<128x128xbf16>, vector<8x128xf32> -> vector<8x128xf32>
    %40 = arith.addf %35, %39 : vector<8x128xf32>
    %c0_27 = arith.constant 0 : index
    %c0_28 = arith.constant 0 : index
    %41 = vector.load %arg5[%c0_27, %c0_28] : memref<1x128xf32, #tpu.memory_space<vmem>>, vector<1x128xf32>
    %42 = vector.broadcast %41 : vector<1x128xf32> to vector<8x128xf32>
    %43 = arith.addf %40, %42 : vector<8x128xf32>
    %cst_29 = arith.constant 0.000000e+00 : f32
    %44 = vector.broadcast %cst_29 : f32 to vector<8x128xf32>
    %45 = arith.maximumf %43, %44 : vector<8x128xf32>
    %46 = arith.truncf %45 : vector<8x128xf32> to vector<8x128xbf16>
    %c0_30 = arith.constant 0 : index
    %c0_31 = arith.constant 0 : index
    %47 = vector.load %arg6[%c0_30, %c0_31] : memref<128x128xbf16, #tpu.memory_space<vmem>>, vector<128x128xbf16>
    %cst_32 = arith.constant dense<0.000000e+00> : vector<8x128xf32>
    %48 = tpu.matmul %46, %47, %cst_32 {dimension_numbers = #tpu.dot_dimension_numbers<[1], [0], [0], [1], [0, 0, 1, 1], [], []>} : vector<8x128xbf16>, vector<128x128xbf16>, vector<8x128xf32> -> vector<8x128xf32>
    %c0_33 = arith.constant 0 : index
    %c0_34 = arith.constant 0 : index
    %49 = vector.load %arg7[%c0_33, %c0_34] : memref<1x128xf32, #tpu.memory_space<vmem>>, vector<1x128xf32>
    %50 = vector.broadcast %49 : vector<1x128xf32> to vector<8x128xf32>
    %51 = arith.addf %48, %50 : vector<8x128xf32>
    %cst_35 = arith.constant 0.000000e+00 : f32
    %52 = vector.broadcast %cst_35 : f32 to vector<8x128xf32>
    %53 = arith.maximumf %51, %52 : vector<8x128xf32>
    %54 = arith.truncf %53 : vector<8x128xf32> to vector<8x128xbf16>
    %c0_36 = arith.constant 0 : index
    %c0_37 = arith.constant 0 : index
    %55 = vector.load %arg8[%c0_36, %c0_37] : memref<128x128xbf16, #tpu.memory_space<vmem>>, vector<128x128xbf16>
    %cst_38 = arith.constant dense<0.000000e+00> : vector<8x128xf32>
    %56 = tpu.matmul %54, %55, %cst_38 {dimension_numbers = #tpu.dot_dimension_numbers<[1], [0], [0], [1], [0, 0, 1, 1], [], []>} : vector<8x128xbf16>, vector<128x128xbf16>, vector<8x128xf32> -> vector<8x128xf32>
    %c0_39 = arith.constant 0 : index
    %c0_40 = arith.constant 0 : index
    %57 = vector.load %arg9[%c0_39, %c0_40] : memref<1x128xf32, #tpu.memory_space<vmem>>, vector<1x128xf32>
    %58 = vector.broadcast %57 : vector<1x128xf32> to vector<8x128xf32>
    %59 = arith.addf %56, %58 : vector<8x128xf32>
    %cst_41 = arith.constant dense<0xFF800000> : vector<8xf32>
    %60 = vector.multi_reduction <maximumf>, %59, %cst_41 [1] : vector<8x128xf32> to vector<8xf32>
    %61 = vector.shape_cast %60 : vector<8xf32> to vector<8x1xf32>
    %62 = vector.broadcast %61 : vector<8x1xf32> to vector<8x128xf32>
    %63 = arith.subf %59, %62 : vector<8x128xf32>
    %64 = math.exp %63 : vector<8x128xf32>
    %cst_42 = arith.constant dense<0.000000e+00> : vector<8xf32>
    %65 = vector.multi_reduction <add>, %64, %cst_42 [1] : vector<8x128xf32> to vector<8xf32>
    %66 = vector.shape_cast %65 : vector<8xf32> to vector<8x1xf32>
    %67 = math.log %66 : vector<8x1xf32>
    %68 = vector.broadcast %67 : vector<8x1xf32> to vector<8x128xf32>
    %69 = arith.subf %63, %68 : vector<8x128xf32>
    %c0_43 = arith.constant 0 : index
    %c0_44 = arith.constant 0 : index
    %70 = vector.load %arg10[%c0_43, %c0_44] : memref<8x128xf32, #tpu.memory_space<vmem>>, vector<8x128xf32>
    tpu.vector_store %arg10[%c0_43, %c0_44], %69 {strides = array<i32>} : memref<8x128xf32, #tpu.memory_space<vmem>>, vector<8x128xf32>,
    return
  }
  func.func @transform_0(%arg0: i32) -> (i32, i32, i32) {
    %c0_i32 = arith.constant 0 : i32
    %c0_i32_0 = arith.constant 0 : i32
    %c0_i32_1 = arith.constant 0 : i32
    return %c0_i32, %arg0, %c0_i32_0 : i32, i32, i32
  }
  func.func @transform_1(%arg0: i32) -> (i32, i32) {
    %c0_i32 = arith.constant 0 : i32
    %c0_i32_0 = arith.constant 0 : i32
    %c0_i32_1 = arith.constant 0 : i32
    return %c0_i32, %c0_i32_0 : i32, i32
  }
  func.func @transform_2(%arg0: i32) -> (i32, i32) {
    %c0_i32 = arith.constant 0 : i32
    %c0_i32_0 = arith.constant 0 : i32
    %c0_i32_1 = arith.constant 0 : i32
    return %c0_i32, %c0_i32_0 : i32, i32
  }
  func.func @transform_3(%arg0: i32) -> (i32, i32, i32) {
    %c0_i32 = arith.constant 0 : i32
    %c0_i32_0 = arith.constant 0 : i32
    %c0_i32_1 = arith.constant 0 : i32
    %c0_i32_2 = arith.constant 0 : i32
    return %c0_i32, %c0_i32_0, %c0_i32_1 : i32, i32, i32
  }
  func.func @transform_4(%arg0: i32) -> (i32, i32) {
    %c0_i32 = arith.constant 0 : i32
    %c0_i32_0 = arith.constant 0 : i32
    %c0_i32_1 = arith.constant 0 : i32
    return %c0_i32, %c0_i32_0 : i32, i32
  }
  func.func @transform_5(%arg0: i32) -> (i32, i32) {
    %c0_i32 = arith.constant 0 : i32
    %c0_i32_0 = arith.constant 0 : i32
    %c0_i32_1 = arith.constant 0 : i32
    return %c0_i32, %c0_i32_0 : i32, i32
  }
  func.func @transform_6(%arg0: i32) -> (i32, i32) {
    %c0_i32 = arith.constant 0 : i32
    %c0_i32_0 = arith.constant 0 : i32
    %c0_i32_1 = arith.constant 0 : i32
    return %c0_i32, %c0_i32_0 : i32, i32
  }
  func.func @transform_7(%arg0: i32) -> (i32, i32) {
    %c0_i32 = arith.constant 0 : i32
    %c0_i32_0 = arith.constant 0 : i32
    %c0_i32_1 = arith.constant 0 : i32
    return %c0_i32, %c0_i32_0 : i32, i32
  }
  func.func @transform_8(%arg0: i32) -> (i32, i32) {
    %c0_i32 = arith.constant 0 : i32
    %c0_i32_0 = arith.constant 0 : i32
    %c0_i32_1 = arith.constant 0 : i32
    return %c0_i32, %c0_i32_0 : i32, i32
  }
  func.func @transform_9(%arg0: i32) -> (i32, i32) {
    %c0_i32 = arith.constant 0 : i32
    %c0_i32_0 = arith.constant 0 : i32
    return %arg0, %c0_i32 : i32, i32
  }
}

</mosaic_0001>

<bundles_post_ra>
// kernel: cnn_cifar_forward.2
= control target key start
LH: loop header
LB: loop body
LE: loop exit
PB: predicated region body
PF: predicated region fallthrough
CT: control target
= control target key end

     0   :  { %s2193_s12 = smov 0   ;;  %s2195_s13 = smov 0   ;;  %s2641_s0 = inlined_call_operand.vmem [shape: bf16[2,224,480], index: 0, kind: input, shape index: {}]   ;;  %s2642_s1 = inlined_call_operand.vmem [shape: bf16[480,256], index: 1, kind: input, shape index: {}]   ;;  %s2643_s2 = inlined_call_operand.vmem [shape: f32[1,128], index: 2, kind: input, shape index: {}]   ;;  %s2644_s3 = inlined_call_operand.vmem [shape: bf16[224,128], index: 3, kind: output, shape index: {}]  }
   0x1   :  { %s2197_s14 = smov 0  }
   0x2 LB: > { %s1652_s15 = sadd.s32 4294967295, %s2171_s14   ;;  %s2210_s16 = sadd.s32 1, %s2171_s14   ;;  %s2171_s14 = sphi %s2197_s14, %s2647_s14   ;;  %s2167_s13 = sphi %s2195_s13, %s2646_s13   ;;  %s2163_s12 = sphi %s2193_s12, %s2645_s12  }
   0x3   : > { %s17_s17 = ssub.s32 %s2171_s14, %s2210_s16  ;;  %s20_s18 = sadd.s32 1, %s2167_s13 }
   0x4   : > { %p18_p0 = scmp.eq.s32.totalorder %s17_s17, 0  ;;  %p27_p1 = scmp.ne.s32.totalorder %s2167_s13, %s2163_s12 }
   0x5   : > { %p28_p2 = scmp.eq.s32.totalorder %s2171_s14, 0  ;;  %p1655_p4 = scmp.ge.s32.totalorder %s2171_s14, 2 }
   0x6   : > { %s2219_s19 = scalar_select %p18_p0, %s2167_s13, %s20_s18  }
   0x7   : > { %p29_p3 = por %p28_p2, %p27_p1  ;;  %127 = sbr.rel (%p1655_p4) target bundleno = 47 (0x2f), region = 24 }
   0xe   : > { %130 = sbr.rel (!%p29_p3) target bundleno = 47 (0x2f), region = 28  ;;  %s132_s20 = sand.u32 (%p29_p3), 1, %s2167_s13  }
   0xf   : > { %s1886_s21 = smul.u32 (%p29_p3), 224, %s2171_s14 }
  0x10   : > { %s1949_s22 = smul.u32 (%p29_p3), 448, %s132_s20 }
  0x11   : > { %s2227_s25 = scalar_lea.vmem (%p29_p3), %s2641_s0, %s1886_s21 }
  0x12   : > { %v151_v0 = vld [vmem:[%s2227_s25] sm:$0xff] (%p29_p3)  ;;  %v153_v1 = vld [vmem:[%s2227_s25 + $0x8] sm:$0xff] (%p29_p3)  ;;  %v155_v2 = vld [vmem:[%s2227_s25 + $0x10] sm:$0xff] (%p29_p3)  ;;  %s2232_s26 = scalar_lea.vmem (%p29_p3), [#allocation2], %s1949_s22 }
  0x13   : > { %152 = vst [vmem:[%s2232_s26] sm:$0xff] (%p29_p3), %v151_v0  ;;  %154 = vst [vmem:[%s2232_s26 + $0x8] sm:$0xff] (%p29_p3), %v153_v1  ;;  %v157_v3 = vld [vmem:[%s2227_s25 + $0x18] sm:$0xff] (%p29_p3)  ;;  %v159_v4 = vld [vmem:[%s2227_s25 + $0x20] sm:$0xff] (%p29_p3) }
  0x14   : > { %156 = vst [vmem:[%s2232_s26 + $0x10] sm:$0xff] (%p29_p3), %v155_v2  ;;  %v161_v5 = vld [vmem:[%s2227_s25 + $0x28] sm:$0xff] (%p29_p3)  ;;  %158 = vst [vmem:[%s2232_s26 + $0x18] sm:$0xff] (%p29_p3), %v157_v3  ;;  %v163_v6 = vld [vmem:[%s2227_s25 + $0x30] sm:$0xff] (%p29_p3) }
  0x15   : > { %160 = vst [vmem:[%s2232_s26 + $0x20] sm:$0xff] %v159_v4  ;;  %162 = vst [vmem:[%s2232_s26 + $0x28] sm:$0xff] %v161_v5  ;;  %v165_v7 = vld [vmem:[%s2227_s25 + $0x38] sm:$0xff]  ;;  %v167_v8 = vld [vmem:[%s2227_s25 + $0x40] sm:$0xff] }
  0x16   : > { %164 = vst [vmem:[%s2232_s26 + $0x30] sm:$0xff] %v163_v6  ;;  %166 = vst [vmem:[%s2232_s26 + $0x38] sm:$0xff] %v165_v7  ;;  %v169_v9 = vld [vmem:[%s2227_s25 + $0x48] sm:$0xff]  ;;  %v171_v10 = vld [vmem:[%s2227_s25 + $0x50] sm:$0xff] }
  0x17   : > { %168 = vst [vmem:[%s2232_s26 + $0x40] sm:$0xff] %v167_v8  ;;  %v173_v11 = vld [vmem:[%s2227_s25 + $0x58] sm:$0xff]  ;;  %170 = vst [vmem:[%s2232_s26 + $0x48] sm:$0xff] %v169_v9  ;;  %v175_v12 = vld [vmem:[%s2227_s25 + $0x60] sm:$0xff] }
  0x18   : > { %172 = vst [vmem:[%s2232_s26 + $0x50] sm:$0xff] %v171_v10  ;;  %174 = vst [vmem:[%s2232_s26 + $0x58] sm:$0xff] %v173_v11  ;;  %v177_v13 = vld [vmem:[%s2227_s25 + $0x68] sm:$0xff]  ;;  %v179_v14 = vld [vmem:[%s2227_s25 + $0x70] sm:$0xff] }
  0x19   : > { %176 = vst [vmem:[%s2232_s26 + $0x60] sm:$0xff] %v175_v12  ;;  %178 = vst [vmem:[%s2232_s26 + $0x68] sm:$0xff] %v177_v13  ;;  %v181_v15 = vld [vmem:[%s2227_s25 + $0x78] sm:$0xff]  ;;  %v183_v16 = vld [vmem:[%s2227_s25 + $0x80] sm:$0xff] }
  0x1a   : > { %180 = vst [vmem:[%s2232_s26 + $0x70] sm:$0xff] %v179_v14  ;;  %v185_v17 = vld [vmem:[%s2227_s25 + $0x88] sm:$0xff]  ;;  %182 = vst [vmem:[%s2232_s26 + $0x78] sm:$0xff] %v181_v15  ;;  %v187_v18 = vld [vmem:[%s2227_s25 + $0x90] sm:$0xff] }
  0x1b   : > { %184 = vst [vmem:[%s2232_s26 + $0x80] sm:$0xff] %v183_v16  ;;  %186 = vst [vmem:[%s2232_s26 + $0x88] sm:$0xff] %v185_v17  ;;  %v189_v19 = vld [vmem:[%s2227_s25 + $0x98] sm:$0xff]  ;;  %v191_v20 = vld [vmem:[%s2227_s25 + $0xa0] sm:$0xff] }
  0x1c   : > { %188 = vst [vmem:[%s2232_s26 + $0x90] sm:$0xff] %v187_v18  ;;  %190 = vst [vmem:[%s2232_s26 + $0x98] sm:$0xff] %v189_v19  ;;  %v193_v21 = vld [vmem:[%s2227_s25 + $0xa8] sm:$0xff]  ;;  %v195_v22 = vld [vmem:[%s2227_s25 + $0xb0] sm:$0xff] }
  0x1d   : > { %192 = vst [vmem:[%s2232_s26 + $0xa0] sm:$0xff] %v191_v20  ;;  %v197_v23 = vld [vmem:[%s2227_s25 + $0xb8] sm:$0xff]  ;;  %194 = vst [vmem:[%s2232_s26 + $0xa8] sm:$0xff] %v193_v21  ;;  %v199_v24 = vld [vmem:[%s2227_s25 + $0xc0] sm:$0xff] }
  0x1e   : > { %196 = vst [vmem:[%s2232_s26 + $0xb0] sm:$0xff] %v195_v22  ;;  %198 = vst [vmem:[%s2232_s26 + $0xb8] sm:$0xff] %v197_v23  ;;  %v201_v25 = vld [vmem:[%s2227_s25 + $0xc8] sm:$0xff]  ;;  %v203_v26 = vld [vmem:[%s2227_s25 + $0xd0] sm:$0xff] }
  0x1f   : > { %200 = vst [vmem:[%s2232_s26 + $0xc0] sm:$0xff] %v199_v24  ;;  %202 = vst [vmem:[%s2232_s26 + $0xc8] sm:$0xff] %v201_v25  ;;  %v205_v27 = vld [vmem:[%s2227_s25 + $0xd8] sm:$0xff]  ;;  %v207_v28 = vld [vmem:[%s2227_s25 + $0x1c0] sm:$0xff] }
  0x20   : > { %204 = vst [vmem:[%s2232_s26 + $0xd0] sm:$0xff] %v203_v26  ;;  %v209_v29 = vld [vmem:[%s2227_s25 + $0x1c8] sm:$0xff]  ;;  %206 = vst [vmem:[%s2232_s26 + $0xd8] sm:$0xff] %v205_v27  ;;  %v211_v30 = vld [vmem:[%s2227_s25 + $0x1d0] sm:$0xff] }
  0x21   : > { %208 = vst [vmem:[%s2232_s26 + $0xe0] sm:$0xff] %v207_v28  ;;  %210 = vst [vmem:[%s2232_s26 + $0xe8] sm:$0xff] %v209_v29  ;;  %v213_v31 = vld [vmem:[%s2227_s25 + $0x1d8] sm:$0xff]  ;;  %v215_v32 = vld [vmem:[%s2227_s25 + $0x1e0] sm:$0xff] }
  0x22   : > { %212 = vst [vmem:[%s2232_s26 + $0xf0] sm:$0xff] %v211_v30  ;;  %214 = vst [vmem:[%s2232_s26 + $0xf8] sm:$0xff] %v213_v31  ;;  %v217_v33 = vld [vmem:[%s2227_s25 + $0x1e8] sm:$0xff]  ;;  %v219_v34 = vld [vmem:[%s2227_s25 + $0x1f0] sm:$0xff] }
  0x23   : > { %216 = vst [vmem:[%s2232_s26 + $0x100] sm:$0xff] %v215_v32  ;;  %v221_v35 = vld [vmem:[%s2227_s25 + $0x1f8] sm:$0xff]  ;;  %218 = vst [vmem:[%s2232_s26 + $0x108] sm:$0xff] %v217_v33  ;;  %v223_v36 = vld [vmem:[%s2227_s25 + $0x200] sm:$0xff] }
  0x24   : > { %220 = vst [vmem:[%s2232_s26 + $0x110] sm:$0xff] %v219_v34  ;;  %222 = vst [vmem:[%s2232_s26 + $0x118] sm:$0xff] %v221_v35  ;;  %v225_v37 = vld [vmem:[%s2227_s25 + $0x208] sm:$0xff]  ;;  %v227_v38 = vld [vmem:[%s2227_s25 + $0x210] sm:$0xff] }
  0x25   : > { %224 = vst [vmem:[%s2232_s26 + $0x120] sm:$0xff] %v223_v36  ;;  %226 = vst [vmem:[%s2232_s26 + $0x128] sm:$0xff] %v225_v37  ;;  %v229_v39 = vld [vmem:[%s2227_s25 + $0x218] sm:$0xff]  ;;  %v231_v40 = vld [vmem:[%s2227_s25 + $0x220] sm:$0xff] }
  0x26   : > { %228 = vst [vmem:[%s2232_s26 + $0x130] sm:$0xff] %v227_v38  ;;  %v233_v41 = vld [vmem:[%s2227_s25 + $0x228] sm:$0xff]  ;;  %230 = vst [vmem:[%s2232_s26 + $0x138] sm:$0xff] %v229_v39  ;;  %v235_v42 = vld [vmem:[%s2227_s25 + $0x230] sm:$0xff] }
  0x27   : > { %232 = vst [vmem:[%s2232_s26 + $0x140] sm:$0xff] %v231_v40  ;;  %234 = vst [vmem:[%s2232_s26 + $0x148] sm:$0xff] %v233_v41  ;;  %v237_v43 = vld [vmem:[%s2227_s25 + $0x238] sm:$0xff]  ;;  %v239_v44 = vld [vmem:[%s2227_s25 + $0x240] sm:$0xff] }
  0x28   : > { %236 = vst [vmem:[%s2232_s26 + $0x150] sm:$0xff] %v235_v42  ;;  %238 = vst [vmem:[%s2232_s26 + $0x158] sm:$0xff] %v237_v43  ;;  %v241_v45 = vld [vmem:[%s2227_s25 + $0x248] sm:$0xff]  ;;  %v243_v46 = vld [vmem:[%s2227_s25 + $0x250] sm:$0xff] }
  0x29   : > { %240 = vst [vmem:[%s2232_s26 + $0x160] sm:$0xff] %v239_v44  ;;  %v245_v47 = vld [vmem:[%s2227_s25 + $0x258] sm:$0xff]  ;;  %242 = vst [vmem:[%s2232_s26 + $0x168] sm:$0xff] %v241_v45  ;;  %v247_v48 = vld [vmem:[%s2227_s25 + $0x260] sm:$0xff] }
  0x2a   : > { %244 = vst [vmem:[%s2232_s26 + $0x170] sm:$0xff] %v243_v46  ;;  %246 = vst [vmem:[%s2232_s26 + $0x178] sm:$0xff] %v245_v47  ;;  %v249_v49 = vld [vmem:[%s2227_s25 + $0x268] sm:$0xff]  ;;  %v251_v50 = vld [vmem:[%s2227_s25 + $0x270] sm:$0xff] }
  0x2b   : > { %248 = vst [vmem:[%s2232_s26 + $0x180] sm:$0xff] %v247_v48  ;;  %250 = vst [vmem:[%s2232_s26 + $0x188] sm:$0xff] %v249_v49  ;;  %v253_v51 = vld [vmem:[%s2227_s25 + $0x278] sm:$0xff]  ;;  %v255_v52 = vld [vmem:[%s2227_s25 + $0x280] sm:$0xff] }
  0x2c   : > { %252 = vst [vmem:[%s2232_s26 + $0x190] sm:$0xff] %v251_v50  ;;  %v257_v53 = vld [vmem:[%s2227_s25 + $0x288] sm:$0xff]  ;;  %254 = vst [vmem:[%s2232_s26 + $0x198] sm:$0xff] %v253_v51  ;;  %v259_v54 = vld [vmem:[%s2227_s25 + $0x290] sm:$0xff] }
  0x2d   : > { %256 = vst [vmem:[%s2232_s26 + $0x1a0] sm:$0xff] %v255_v52  ;;  %258 = vst [vmem:[%s2232_s26 + $0x1a8] sm:$0xff] %v257_v53  ;;  %v261_v55 = vld [vmem:[%s2227_s25 + $0x298] sm:$0xff] }
  0x2e   : > { %260 = vst [vmem:[%s2232_s26 + $0x1b0] sm:$0xff] %v259_v54  ;;  %262 = vst [vmem:[%s2232_s26 + $0x1b8] sm:$0xff] %v261_v55 }
  0x2f PF: > { %p1658_p5 = scmp.ge.s32.totalorder %s2171_s14, 1  ;;  %p267_p6 = scmp.lt.s32.totalorder %s2171_s14, 3 }
  0x31   : > { %p268_p7 = pnand %p1658_p5, %p267_p6 }
  0x32   : > { %v1975_v56 = vld [vmem:[%s2642_s1 + $0x4] ss:$8 sps:$4 sm:$0xff] (!%p268_p7)   ;;  %v1977_v57 = vld [vmem:[%s2642_s1] ss:$8 sps:$4 sm:$0xff] (!%p268_p7)   ;;  %v1978_v58 = vld [vmem:[%s2642_s1 + $0x14] ss:$8 sps:$4 sm:$0xff] (!%p268_p7)  }
  0x33   : > { %271 = sbr.rel (%p268_p7) target bundleno = 445 (0x1bd), region = 51  ;;  %848 = vmatprep.subr.bf16.mxu0 (!%p268_p7), %v1975_v56  ;;  %1237 = vmatprep.subr.bf16.mxu1 (!%p268_p7), %v1975_v56  ;;  %v1980_v59 = vld [vmem:[%s2642_s1 + $0x10] ss:$8 sps:$4 sm:$0xff] (!%p268_p7)   ;;  %v1981_v60 = vld [vmem:[%s2642_s1 + $0x24] ss:$8 sps:$4 sm:$0xff] (!%p268_p7)   ;;  %s274_s24 = sand.u32 (!%p268_p7), 1, %s2163_s12  }
  0x34   : > { %849 = vmatpush1.bf16.msra.mxu0 (!%p268_p7), %v1977_v57  ;;  %1238 = vmatpush1.bf16.msra.mxu1 (!%p268_p7), %v1977_v57  ;;  %v1983_v61 = vld [vmem:[%s2642_s1 + $0x20] ss:$8 sps:$4 sm:$0xff] (!%p268_p7)   ;;  %v1984_v62 = vld [vmem:[%s2642_s1 + $0x34] ss:$8 sps:$4 sm:$0xff] (!%p268_p7)   ;;  %v1986_v63 = vld [vmem:[%s2642_s1 + $0x30] ss:$8 sps:$4 sm:$0xff] (!%p268_p7)  }
  0x35   : > { %850 = vmatprep.subr.bf16.mxu0 (!%p268_p7), %v1978_v58  ;;  %1239 = vmatprep.subr.bf16.mxu1 (!%p268_p7), %v1978_v58  ;;  %v1987_v0 = vld [vmem:[%s2642_s1 + $0x44] ss:$8 sps:$4 sm:$0xff] (!%p268_p7)   ;;  %v1989_v1 = vld [vmem:[%s2642_s1 + $0x40] ss:$8 sps:$4 sm:$0xff] (!%p268_p7)   ;;  %s1950_s27 = smul.u32 (!%p268_p7), 448, %s274_s24  ;;  %vm826_vm0 = vcmask (!%p268_p7), 785408  }
  0x36   : > { %v1990_v2 = vld [vmem:[%s2642_s1 + $0x54] ss:$8 sps:$4 sm:$0xff] (!%p268_p7)   ;;  %v1992_v3 = vld [vmem:[%s2642_s1 + $0x50] ss:$8 sps:$4 sm:$0xff] (!%p268_p7)   ;;  %v1993_v4 = vld [vmem:[%s2642_s1 + $0x64] ss:$8 sps:$4 sm:$0xff] (!%p268_p7)  }
  0x37   : > { %s2385_s6 = scalar_lea.vmem (!%p268_p7), [#allocation2], %s1950_s27  ;;  %v1995_v6 = vld [vmem:[%s2642_s1 + $0x60] ss:$8 sps:$4 sm:$0xff] (!%p268_p7)   ;;  %v1996_v8 = vld [vmem:[%s2642_s1 + $0x74] ss:$8 sps:$4 sm:$0xff] (!%p268_p7)   ;;  %s298_s23 = smul.u32 (!%p268_p7), 14, %s1652_s15 }
  0x38   : > { %851 = vmatpush1.bf16.msra.mxu0 (!%p268_p7), %v1980_v59  ;;  %1240 = vmatpush1.bf16.msra.mxu1 (!%p268_p7), %v1980_v59  ;;  %v2025_v5 = vld [vmem:[%s2385_s6 + $0x4] ss:$16 sps:$4 sm:$0xff] (!%p268_p7)   ;;  %v1998_v9 = vld [vmem:[%s2642_s1 + $0x70] ss:$8 sps:$4 sm:$0xff] (!%p268_p7)   ;;  %v2001_v11 = vld [vmem:[%s2642_s1 + $0x80] ss:$8 sps:$4 sm:$0xff] (!%p268_p7)  }
  0x39   : > { %852 = vmatprep.subr.bf16.mxu0 (!%p268_p7), %v1981_v60  ;;  %1241 = vmatprep.subr.bf16.mxu1 (!%p268_p7), %v1981_v60  ;;  %v2028_v7 = vld [vmem:[%s2385_s6 + $0xe4] ss:$16 sps:$4 sm:$0xff] (!%p268_p7)   ;;  %v2004_v13 = vld [vmem:[%s2642_s1 + $0x90] ss:$8 sps:$4 sm:$0xff] (!%p268_p7)   ;;  %v2007_v15 = vld [vmem:[%s2642_s1 + $0xa0] ss:$8 sps:$4 sm:$0xff] (!%p268_p7)  }
  0x3a   : > { %880 = vmatprep.mubr.bf16.mxu0 %v2025_v5  ;;  %1269 = vmatprep.mubr.bf16.mxu1 %v2028_v7  ;;  %v1999_v10 = vld [vmem:[%s2642_s1 + $0x84] ss:$8 sps:$4 sm:$0xff]   ;;  %v2002_v12 = vld [vmem:[%s2642_s1 + $0x94] ss:$8 sps:$4 sm:$0xff]   ;;  %v2010_v17 = vld [vmem:[%s2642_s1 + $0xb0] ss:$8 sps:$4 sm:$0xff]  }
  0x3b   : > { %v2005_v14 = vld [vmem:[%s2642_s1 + $0xa4] ss:$8 sps:$4 sm:$0xff]   ;;  %v2008_v16 = vld [vmem:[%s2642_s1 + $0xb4] ss:$8 sps:$4 sm:$0xff]   ;;  %v2013_v19 = vld [vmem:[%s2642_s1 + $0xc0] ss:$8 sps:$4 sm:$0xff]  }
  0x3c   : > { %853 = vmatpush1.bf16.msra.mxu0 %v1983_v61  ;;  %1242 = vmatpush1.bf16.msra.mxu1 %v1983_v61  ;;  %v2011_v18 = vld [vmem:[%s2642_s1 + $0xc4] ss:$8 sps:$4 sm:$0xff]   ;;  %v2014_v20 = vld [vmem:[%s2642_s1 + $0xd4] ss:$8 sps:$4 sm:$0xff]   ;;  %v2016_v21 = vld [vmem:[%s2642_s1 + $0xd0] ss:$8 sps:$4 sm:$0xff]  }
  0x3d   : > { %854 = vmatprep.subr.bf16.mxu0 %v1984_v62  ;;  %1243 = vmatprep.subr.bf16.mxu1 %v1984_v62  ;;  %v2017_v22 = vld [vmem:[%s2642_s1 + $0xe4] ss:$8 sps:$4 sm:$0xff]   ;;  %v2019_v23 = vld [vmem:[%s2642_s1 + $0xe0] ss:$8 sps:$4 sm:$0xff]   ;;  %v2020_v24 = vld [vmem:[%s2642_s1 + $0xf4] ss:$8 sps:$4 sm:$0xff]  }
  0x3e   : > { %v2022_v25 = vld [vmem:[%s2642_s1 + $0xf0] ss:$8 sps:$4 sm:$0xff]   ;;  %v2031_v26 = vld [vmem:[%s2642_s1 + $0x104] ss:$8 sps:$4 sm:$0xff]   ;;  %v2029_v29 = vld [vmem:[%s2642_s1 + $0x100] ss:$8 sps:$4 sm:$0xff]  }
  0x3f   : > { %v2023_v27 = vld [vmem:[%s2385_s6] ss:$16 sps:$4 sm:$0xff]   ;;  %v2034_v30 = vld [vmem:[%s2642_s1 + $0x114] ss:$8 sps:$4 sm:$0xff]   ;;  %v2042_v34 = vld [vmem:[%s2642_s1 + $0x124] ss:$8 sps:$4 sm:$0xff]  }
  0x40   : > { %855 = vmatpush1.bf16.msra.mxu0 %v1986_v63  ;;  %1244 = vmatpush1.bf16.msra.mxu1 %v1986_v63  ;;  %v2026_v28 = vld [vmem:[%s2385_s6 + $0xe0] ss:$16 sps:$4 sm:$0xff]   ;;  %v2035_v31 = vld [vmem:[%s2385_s6 + $0x24] ss:$16 sps:$4 sm:$0xff]   ;;  %p299_p8 = scmp.lt.s32.totalorder %s298_s23, 27 }
  0x41   : > { %856 = vmatprep.subr.bf16.mxu0 %v1987_v0  ;;  %1245 = vmatprep.subr.bf16.mxu1 %v1987_v0  ;;  %v2037_v32 = vld [vmem:[%s2385_s6 + $0x104] ss:$16 sps:$4 sm:$0xff]   ;;  %v2032_v33 = vld [vmem:[%s2642_s1 + $0x110] ss:$8 sps:$4 sm:$0xff]   ;;  %v2040_v37 = vld [vmem:[%s2642_s1 + $0x120] ss:$8 sps:$4 sm:$0xff]  }
  0x42   : > { %v2039_v35 = vld [vmem:[%s2385_s6 + $0x20] ss:$16 sps:$4 sm:$0xff]   ;;  %v2046_v38 = vld [vmem:[%s2642_s1 + $0x134] ss:$8 sps:$4 sm:$0xff]   ;;  %v2054_v42 = vld [vmem:[%s2642_s1 + $0x144] ss:$8 sps:$4 sm:$0xff]  }
  0x43   : > { %v2043_v36 = vld [vmem:[%s2385_s6 + $0x100] ss:$16 sps:$4 sm:$0xff]   ;;  %v2047_v39 = vld [vmem:[%s2385_s6 + $0x44] ss:$16 sps:$4 sm:$0xff]   ;;  %s2649_s23 = smov (!%p299_p8, %s298_s23), 27 }
  0x44   : > { %857 = vmatpush1.bf16.msra.mxu0 %v1989_v1  ;;  %1246 = vmatpush1.bf16.msra.mxu1 %v1989_v1  ;;  %v2049_v40 = vld [vmem:[%s2385_s6 + $0x124] ss:$16 sps:$4 sm:$0xff]   ;;  %v2044_v41 = vld [vmem:[%s2642_s1 + $0x130] ss:$8 sps:$4 sm:$0xff]   ;;  %v2052_v45 = vld [vmem:[%s2642_s1 + $0x140] ss:$8 sps:$4 sm:$0xff]  }
  0x45   : > { %858 = vmatprep.subr.bf16.mxu0 %v1990_v2  ;;  %1247 = vmatprep.subr.bf16.mxu1 %v1990_v2  ;;  %v2051_v43 = vld [vmem:[%s2385_s6 + $0x40] ss:$16 sps:$4 sm:$0xff]   ;;  %v2058_v46 = vld [vmem:[%s2642_s1 + $0x154] ss:$8 sps:$4 sm:$0xff]   ;;  %v2066_v50 = vld [vmem:[%s2642_s1 + $0x164] ss:$8 sps:$4 sm:$0xff]  }
  0x46   : > { %v2055_v44 = vld [vmem:[%s2385_s6 + $0x120] ss:$16 sps:$4 sm:$0xff]   ;;  %v2059_v47 = vld [vmem:[%s2385_s6 + $0x64] ss:$16 sps:$4 sm:$0xff]   ;;  %s1659_s14 = sshll.u32 %s2649_s23, 2 }
  0x47   : > { %v2061_v48 = vld [vmem:[%s2385_s6 + $0x144] ss:$16 sps:$4 sm:$0xff]   ;;  %v2056_v49 = vld [vmem:[%s2642_s1 + $0x150] ss:$8 sps:$4 sm:$0xff]   ;;  %v2064_v53 = vld [vmem:[%s2642_s1 + $0x160] ss:$8 sps:$4 sm:$0xff]   ;;  %s2610_s26 = scalar_lea.vmem %s2644_s3, %s1659_s14 }
  0x48   : > { %859 = vmatpush1.bf16.msra.mxu0 %v1992_v3  ;;  %1248 = vmatpush1.bf16.msra.mxu1 %v1992_v3  ;;  %v2063_v51 = vld [vmem:[%s2385_s6 + $0x60] ss:$16 sps:$4 sm:$0xff]   ;;  %v2070_v54 = vld [vmem:[%s2642_s1 + $0x174] ss:$8 sps:$4 sm:$0xff]   ;;  %v2078_v58 = vld [vmem:[%s2642_s1 + $0x184] ss:$8 sps:$4 sm:$0xff]  }
  0x49   : > { %860 = vmatprep.subr.bf16.mxu0 %v1993_v4  ;;  %1249 = vmatprep.subr.bf16.mxu1 %v1993_v4  ;;  %v2067_v52 = vld [vmem:[%s2385_s6 + $0x140] ss:$16 sps:$4 sm:$0xff]   ;;  %v2071_v55 = vld [vmem:[%s2385_s6 + $0x84] ss:$16 sps:$4 sm:$0xff]  }
  0x4a   : > { %v2073_v56 = vld [vmem:[%s2385_s6 + $0x164] ss:$16 sps:$4 sm:$0xff]   ;;  %v2068_v57 = vld [vmem:[%s2642_s1 + $0x170] ss:$8 sps:$4 sm:$0xff]   ;;  %v2076_v61 = vld [vmem:[%s2642_s1 + $0x180] ss:$8 sps:$4 sm:$0xff]  }
  0x4b   : > { %v2075_v59 = vld [vmem:[%s2385_s6 + $0x80] ss:$16 sps:$4 sm:$0xff]   ;;  %v2082_v62 = vld [vmem:[%s2642_s1 + $0x194] ss:$8 sps:$4 sm:$0xff]   ;;  %v2090_v2 = vld [vmem:[%s2642_s1 + $0x1a4] ss:$8 sps:$4 sm:$0xff]  }
  0x4c   : > { %861 = vmatpush1.bf16.msra.mxu0 %v1995_v6  ;;  %1250 = vmatpush1.bf16.msra.mxu1 %v1995_v6  ;;  %v2079_v60 = vld [vmem:[%s2385_s6 + $0x160] ss:$16 sps:$4 sm:$0xff]   ;;  %v2083_v63 = vld [vmem:[%s2385_s6 + $0xa4] ss:$16 sps:$4 sm:$0xff]  }
  0x4d   : > { %862 = vmatprep.subr.bf16.mxu0 %v1996_v8  ;;  %1251 = vmatprep.subr.bf16.mxu1 %v1996_v8  ;;  %v2085_v0 = vld [vmem:[%s2385_s6 + $0x184] ss:$16 sps:$4 sm:$0xff]   ;;  %v2080_v1 = vld [vmem:[%s2642_s1 + $0x190] ss:$8 sps:$4 sm:$0xff]   ;;  %v2088_v5 = vld [vmem:[%s2642_s1 + $0x1a0] ss:$8 sps:$4 sm:$0xff]  }
  0x4e   : > { %v2087_v3 = vld [vmem:[%s2385_s6 + $0xa0] ss:$16 sps:$4 sm:$0xff]   ;;  %v2094_v6 = vld [vmem:[%s2642_s1 + $0x1b4] ss:$8 sps:$4 sm:$0xff]  }
  0x4f   : > { %v2091_v4 = vld [vmem:[%s2385_s6 + $0x180] ss:$16 sps:$4 sm:$0xff]   ;;  %v2095_v7 = vld [vmem:[%s2385_s6 + $0xc4] ss:$16 sps:$4 sm:$0xff]  }
  0x50   : > { %863 = vmatpush1.bf16.msra.mxu0 %v1998_v9  ;;  %1252 = vmatpush1.bf16.msra.mxu1 %v1998_v9  ;;  %v2097_v8 = vld [vmem:[%s2385_s6 + $0x1a4] ss:$16 sps:$4 sm:$0xff]   ;;  %v2092_v9 = vld [vmem:[%s2642_s1 + $0x1b0] ss:$8 sps:$4 sm:$0xff]  }
  0x51   : > { %864 = vmatprep.subr.bf16.mxu0 %v1999_v10  ;;  %1253 = vmatprep.subr.bf16.mxu1 %v1999_v10  ;;  %v2102_v10 = vld [vmem:[%s2642_s1 + $0x1c4] ss:$8 sps:$4 sm:$0xff]  }
  0x54   : > { %865 = vmatpush1.bf16.msra.mxu0 %v2001_v11  ;;  %1254 = vmatpush1.bf16.msra.mxu1 %v2001_v11  ;;  %v2099_v11 = vld [vmem:[%s2385_s6 + $0xc0] ss:$16 sps:$4 sm:$0xff]  }
  0x55   : > { %866 = vmatprep.subr.bf16.mxu0 %v2002_v12  ;;  %1255 = vmatprep.subr.bf16.mxu1 %v2002_v12  ;;  %v2103_v12 = vld [vmem:[%s2385_s6 + $0x1a0] ss:$16 sps:$4 sm:$0xff]  }
  0x58   : > { %867 = vmatpush1.bf16.msra.mxu0 %v2004_v13  ;;  %1256 = vmatpush1.bf16.msra.mxu1 %v2004_v13  ;;  %v2100_v13 = vld [vmem:[%s2642_s1 + $0x1c0] ss:$8 sps:$4 sm:$0xff]  }
  0x59   : > { %868 = vmatprep.subr.bf16.mxu0 %v2005_v14  ;;  %1257 = vmatprep.subr.bf16.mxu1 %v2005_v14  ;;  %v2106_v14 = vld [vmem:[%s2642_s1 + $0x1d4] ss:$8 sps:$4 sm:$0xff]  }
  0x5c   : > { %869 = vmatpush1.bf16.msra.mxu0 %v2007_v15  ;;  %1258 = vmatpush1.bf16.msra.mxu1 %v2007_v15  ;;  %v2109_v15 = vld [vmem:[%s2385_s6 + $0xc] ss:$16 sps:$4 sm:$0xff]  }
  0x5d   : > { %870 = vmatprep.subr.bf16.mxu0 %v2008_v16  ;;  %1259 = vmatprep.subr.bf16.mxu1 %v2008_v16  ;;  %v2112_v16 = vld [vmem:[%s2385_s6 + $0xec] ss:$16 sps:$4 sm:$0xff]  }
  0x60   : > { %871 = vmatpush1.bf16.msra.mxu0 %v2010_v17  ;;  %1260 = vmatpush1.bf16.msra.mxu1 %v2010_v17  ;;  %v2104_v17 = vld [vmem:[%s2642_s1 + $0x1d0] ss:$8 sps:$4 sm:$0xff]  }
  0x61   : > { %872 = vmatprep.subr.bf16.mxu0 %v2011_v18  ;;  %1261 = vmatprep.subr.bf16.mxu1 %v2011_v18  ;;  %v2107_v18 = vld [vmem:[%s2385_s6 + $0x8] ss:$16 sps:$4 sm:$0xff]  }
  0x64   : > { %873 = vmatpush1.bf16.msra.mxu0 %v2013_v19  ;;  %1262 = vmatpush1.bf16.msra.mxu1 %v2013_v19  ;;  %v2110_v19 = vld [vmem:[%s2385_s6 + $0xe8] ss:$16 sps:$4 sm:$0xff]  }
  0x65   : > { %874 = vmatprep.subr.bf16.mxu0 %v2014_v20  ;;  %1263 = vmatprep.subr.bf16.mxu1 %v2014_v20  ;;  %v2113_v20 = vld [vmem:[%s2385_s6 + $0x2c] ss:$16 sps:$4 sm:$0xff]  }
  0x68   : > { %875 = vmatpush1.bf16.msra.mxu0 %v2016_v21  ;;  %1264 = vmatpush1.bf16.msra.mxu1 %v2016_v21  ;;  %v2115_v21 = vld [vmem:[%s2385_s6 + $0x10c] ss:$16 sps:$4 sm:$0xff]  }
  0x69   : > { %876 = vmatprep.subr.bf16.mxu0 %v2017_v22  ;;  %1265 = vmatprep.subr.bf16.mxu1 %v2017_v22  ;;  %v2117_v22 = vld [vmem:[%s2385_s6 + $0x28] ss:$16 sps:$4 sm:$0xff]  }
  0x6c   : > { %877 = vmatpush1.bf16.msra.mxu0 %v2019_v23  ;;  %1266 = vmatpush1.bf16.msra.mxu1 %v2019_v23  ;;  %v2118_v23 = vld [vmem:[%s2385_s6 + $0x108] ss:$16 sps:$4 sm:$0xff]  }
  0x6d   : > { %878 = vmatprep.subr.bf16.mxu0 %v2020_v24  ;;  %1267 = vmatprep.subr.bf16.mxu1 %v2020_v24  ;;  %v2119_v24 = vld [vmem:[%s2385_s6 + $0x4c] ss:$16 sps:$4 sm:$0xff]  }
  0x70   : > { %879 = vmatpush1.bf16.msra.mxu0 %v2022_v25  ;;  %1268 = vmatpush1.bf16.msra.mxu1 %v2022_v25  ;;  %v2121_v25 = vld [vmem:[%s2385_s6 + $0x12c] ss:$16 sps:$4 sm:$0xff]  }
  0x71   : > { %951 = vmatprep.subr.bf16.mxu0 %v2031_v26  ;;  %1340 = vmatprep.subr.bf16.mxu1 %v2031_v26  ;;  %v2123_v26 = vld [vmem:[%s2385_s6 + $0x48] ss:$16 sps:$4 sm:$0xff]  }
  0x73   : > { %881 = vmatmul.mubr.bf16.vlgmr.msra.gmra.mrb[0].mxu0 %v2023_v27  ;;  %1270 = vmatmul.mubr.bf16.vlgmr.msra.gmra.mrb[0].mxu1 %v2026_v28  ;;  %v2124_v27 = vld [vmem:[%s2385_s6 + $0x128] ss:$16 sps:$4 sm:$0xff]   ;;  %v2125_v28 = vld [vmem:[%s2385_s6 + $0x6c] ss:$16 sps:$4 sm:$0xff]  }
  0x74   : > { %952 = vmatpush1.bf16.msra.mxu0 %v2029_v29  ;;  %1341 = vmatpush1.bf16.msra.mxu1 %v2029_v29  ;;  %v2127_v29 = vld [vmem:[%s2385_s6 + $0x14c] ss:$16 sps:$4 sm:$0xff]  }
  0x75   : > { %953 = vmatprep.subr.bf16.mxu0 %v2034_v30  ;;  %1342 = vmatprep.subr.bf16.mxu1 %v2034_v30  ;;  %v2129_v30 = vld [vmem:[%s2385_s6 + $0x68] ss:$16 sps:$4 sm:$0xff]  }
  0x76   : > { %890 = vmatprep.mubr.bf16.mxu0 %v2035_v31  ;;  %1279 = vmatprep.mubr.bf16.mxu1 %v2037_v32  ;;  %v2130_v31 = vld [vmem:[%s2385_s6 + $0x148] ss:$16 sps:$4 sm:$0xff]   ;;  %v2131_v32 = vld [vmem:[%s2385_s6 + $0x8c] ss:$16 sps:$4 sm:$0xff]  }
  0x78   : > { %954 = vmatpush1.bf16.msra.mxu0 %v2032_v33  ;;  %1343 = vmatpush1.bf16.msra.mxu1 %v2032_v33  ;;  %v2133_v33 = vld [vmem:[%s2385_s6 + $0x16c] ss:$16 sps:$4 sm:$0xff]  }
  0x79   : > { %955 = vmatprep.subr.bf16.mxu0 %v2042_v34  ;;  %1344 = vmatprep.subr.bf16.mxu1 %v2042_v34  ;;  %v2135_v34 = vld [vmem:[%s2385_s6 + $0x88] ss:$16 sps:$4 sm:$0xff]  }
  0x7b   : > { %891 = vmatmul.mubr.bf16.gmra.mrb[4].mxu0 %v2039_v35  ;;  %1280 = vmatmul.mubr.bf16.gmra.mrb[4].mxu1 %v2043_v36  ;;  %v2136_v35 = vld [vmem:[%s2385_s6 + $0x168] ss:$16 sps:$4 sm:$0xff]   ;;  %v2137_v36 = vld [vmem:[%s2385_s6 + $0xac] ss:$16 sps:$4 sm:$0xff]  }
  0x7c   : > { %956 = vmatpush1.bf16.msra.mxu0 %v2040_v37  ;;  %1345 = vmatpush1.bf16.msra.mxu1 %v2040_v37  ;;  %v2139_v37 = vld [vmem:[%s2385_s6 + $0x18c] ss:$16 sps:$4 sm:$0xff]  }
  0x7d   : > { %957 = vmatprep.subr.bf16.mxu0 %v2046_v38  ;;  %1346 = vmatprep.subr.bf16.mxu1 %v2046_v38  ;;  %v2141_v38 = vld [vmem:[%s2385_s6 + $0xa8] ss:$16 sps:$4 sm:$0xff]  }
  0x7e   : > { %900 = vmatprep.mubr.bf16.mxu0 %v2047_v39  ;;  %1289 = vmatprep.mubr.bf16.mxu1 %v2049_v40  ;;  %v2142_v39 = vld [vmem:[%s2385_s6 + $0x188] ss:$16 sps:$4 sm:$0xff]   ;;  %v2143_v40 = vld [vmem:[%s2385_s6 + $0xcc] ss:$16 sps:$4 sm:$0xff]  }
  0x80   : > { %958 = vmatpush1.bf16.msra.mxu0 %v2044_v41  ;;  %1347 = vmatpush1.bf16.msra.mxu1 %v2044_v41  ;;  %v2145_v41 = vld [vmem:[%s2385_s6 + $0x1ac] ss:$16 sps:$4 sm:$0xff]  }
  0x81   : > { %959 = vmatprep.subr.bf16.mxu0 %v2054_v42  ;;  %1348 = vmatprep.subr.bf16.mxu1 %v2054_v42  ;;  %v2147_v42 = vld [vmem:[%s2385_s6 + $0xc8] ss:$16 sps:$4 sm:$0xff]  }
  0x83   : > { %901 = vmatmul.mubr.bf16.gmra.mrb[8].mxu0 %v2051_v43  ;;  %1290 = vmatmul.mubr.bf16.gmra.mrb[8].mxu1 %v2055_v44  ;;  %v2148_v43 = vld [vmem:[%s2385_s6 + $0x1a8] ss:$16 sps:$4 sm:$0xff]  }
  0x84   : > { %960 = vmatpush1.bf16.msra.mxu0 %v2052_v45  ;;  %1349 = vmatpush1.bf16.msra.mxu1 %v2052_v45 }
  0x85   : > { %961 = vmatprep.subr.bf16.mxu0 %v2058_v46  ;;  %1350 = vmatprep.subr.bf16.mxu1 %v2058_v46 }
  0x86   : > { %910 = vmatprep.mubr.bf16.mxu0 %v2059_v47  ;;  %1299 = vmatprep.mubr.bf16.mxu1 %v2061_v48 }
  0x88   : > { %962 = vmatpush1.bf16.msra.mxu0 %v2056_v49  ;;  %1351 = vmatpush1.bf16.msra.mxu1 %v2056_v49 }
  0x89   : > { %963 = vmatprep.subr.bf16.mxu0 %v2066_v50  ;;  %1352 = vmatprep.subr.bf16.mxu1 %v2066_v50 }
  0x8b   : > { %911 = vmatmul.mubr.bf16.gmra.mrb[12].mxu0 %v2063_v51  ;;  %1300 = vmatmul.mubr.bf16.gmra.mrb[12].mxu1 %v2067_v52  ;;  %v2603_v52 = vld [vmem:[%s2643_s2] ss:$0 sm:$0xff] }
  0x8c   : > { %964 = vmatpush1.bf16.msra.mxu0 %v2064_v53  ;;  %1353 = vmatpush1.bf16.msra.mxu1 %v2064_v53 }
  0x8d   : > { %965 = vmatprep.subr.bf16.mxu0 %v2070_v54  ;;  %1354 = vmatprep.subr.bf16.mxu1 %v2070_v54 }
  0x8e   : > { %920 = vmatprep.mubr.bf16.mxu0 %v2071_v55  ;;  %1309 = vmatprep.mubr.bf16.mxu1 %v2073_v56 }
  0x90   : > { %966 = vmatpush1.bf16.msra.mxu0 %v2068_v57  ;;  %1355 = vmatpush1.bf16.msra.mxu1 %v2068_v57 }
  0x91   : > { %967 = vmatprep.subr.bf16.mxu0 %v2078_v58  ;;  %1356 = vmatprep.subr.bf16.mxu1 %v2078_v58 }
  0x93   : > { %921 = vmatmul.mubr.bf16.gmra.mrb[16].mxu0 %v2075_v59  ;;  %1310 = vmatmul.mubr.bf16.gmra.mrb[16].mxu1 %v2079_v60 }
  0x94   : > { %968 = vmatpush1.bf16.msra.mxu0 %v2076_v61  ;;  %1357 = vmatpush1.bf16.msra.mxu1 %v2076_v61 }
  0x95   : > { %969 = vmatprep.subr.bf16.mxu0 %v2082_v62  ;;  %1358 = vmatprep.subr.bf16.mxu1 %v2082_v62 }
  0x96   : > { %930 = vmatprep.mubr.bf16.mxu0 %v2083_v63  ;;  %1319 = vmatprep.mubr.bf16.mxu1 %v2085_v0 }
  0x98   : > { %970 = vmatpush1.bf16.msra.mxu0 %v2080_v1  ;;  %1359 = vmatpush1.bf16.msra.mxu1 %v2080_v1 }
  0x99   : > { %971 = vmatprep.subr.bf16.mxu0 %v2090_v2  ;;  %1360 = vmatprep.subr.bf16.mxu1 %v2090_v2 }
  0x9b   : > { %931 = vmatmul.mubr.bf16.gmra.mrb[20].mxu0 %v2087_v3  ;;  %1320 = vmatmul.mubr.bf16.gmra.mrb[20].mxu1 %v2091_v4 }
  0x9c   : > { %972 = vmatpush1.bf16.msra.mxu0 %v2088_v5  ;;  %1361 = vmatpush1.bf16.msra.mxu1 %v2088_v5 }
  0x9d   : > { %973 = vmatprep.subr.bf16.mxu0 %v2094_v6  ;;  %1362 = vmatprep.subr.bf16.mxu1 %v2094_v6 }
  0x9e   : > { %940 = vmatprep.mubr.bf16.mxu0 %v2095_v7  ;;  %1329 = vmatprep.mubr.bf16.mxu1 %v2097_v8 }
  0xa0   : > { %974 = vmatpush1.bf16.msra.mxu0 %v2092_v9  ;;  %1363 = vmatpush1.bf16.msra.mxu1 %v2092_v9 }
  0xa1   : > { %975 = vmatprep.subr.bf16.mxu0 %v2102_v10  ;;  %1364 = vmatprep.subr.bf16.mxu1 %v2102_v10 }
  0xa3   : > { %941 = vmatmul.mubr.bf16.gmra.mrb[24].mxu0 %v2099_v11  ;;  %1330 = vmatmul.mubr.bf16.gmra.mrb[24].mxu1 %v2103_v12 }
  0xa4   : > { %976 = vmatpush1.bf16.msra.mxu0 %v2100_v13  ;;  %1365 = vmatpush1.bf16.msra.mxu1 %v2100_v13 }
  0xa5   : > { %977 = vmatprep.subr.bf16.mxu0 %v2106_v14  ;;  %1366 = vmatprep.subr.bf16.mxu1 %v2106_v14 }
  0xa6   : > { %1748 = vmatprep.mubr.msk.bf16.mxu0 %vm826_vm0, %v2109_v15  ;;  %1811 = vmatprep.mubr.msk.bf16.mxu1 %vm826_vm0, %v2112_v16 }
  0xa8   : > { %978 = vmatpush1.bf16.msra.mxu0 %v2104_v17  ;;  %1367 = vmatpush1.bf16.msra.mxu1 %v2104_v17 }
  0xab   : > { %984 = vmatmul.mubr.bf16.vlgmr.msra.gmra.mrb[0].mxu0 %v2107_v18  ;;  %1373 = vmatmul.mubr.bf16.vlgmr.msra.gmra.mrb[0].mxu1 %v2110_v19 }
  0xac   : > { %1749 = vmatprep.mubr.msk.bf16.mxu0 %vm826_vm0, %v2113_v20  ;;  %1812 = vmatprep.mubr.msk.bf16.mxu1 %vm826_vm0, %v2115_v21 }
  0xb3   : > { %994 = vmatmul.mubr.bf16.gmra.mrb[4].mxu0 %v2117_v22  ;;  %1383 = vmatmul.mubr.bf16.gmra.mrb[4].mxu1 %v2118_v23 }
  0xb4   : > { %1750 = vmatprep.mubr.msk.bf16.mxu0 %vm826_vm0, %v2119_v24  ;;  %1813 = vmatprep.mubr.msk.bf16.mxu1 %vm826_vm0, %v2121_v25 }
  0xbb   : > { %1004 = vmatmul.mubr.bf16.gmra.mrb[8].mxu0 %v2123_v26  ;;  %1393 = vmatmul.mubr.bf16.gmra.mrb[8].mxu1 %v2124_v27 }
  0xbc   : > { %1751 = vmatprep.mubr.msk.bf16.mxu0 %vm826_vm0, %v2125_v28  ;;  %1814 = vmatprep.mubr.msk.bf16.mxu1 %vm826_vm0, %v2127_v29 }
  0xc3   : > { %1014 = vmatmul.mubr.bf16.gmra.mrb[12].mxu0 %v2129_v30  ;;  %1403 = vmatmul.mubr.bf16.gmra.mrb[12].mxu1 %v2130_v31 }
  0xc4   : > { %1752 = vmatprep.mubr.msk.bf16.mxu0 %vm826_vm0, %v2131_v32  ;;  %1815 = vmatprep.mubr.msk.bf16.mxu1 %vm826_vm0, %v2133_v33 }
  0xcb   : > { %1024 = vmatmul.mubr.bf16.gmra.mrb[16].mxu0 %v2135_v34  ;;  %1413 = vmatmul.mubr.bf16.gmra.mrb[16].mxu1 %v2136_v35 }
  0xcc   : > { %1753 = vmatprep.mubr.msk.bf16.mxu0 %vm826_vm0, %v2137_v36  ;;  %1816 = vmatprep.mubr.msk.bf16.mxu1 %vm826_vm0, %v2139_v37 }
  0xd3   : > { %1034 = vmatmul.mubr.bf16.gmra.mrb[20].mxu0 %v2141_v38  ;;  %1423 = vmatmul.mubr.bf16.gmra.mrb[20].mxu1 %v2142_v39 }
  0xd4   : > { %1754 = vmatprep.mubr.msk.bf16.mxu0 %vm826_vm0, %v2143_v40  ;;  %1817 = vmatprep.mubr.msk.bf16.mxu1 %vm826_vm0, %v2145_v41 }
  0xdb   : > { %1044 = vmatmul.mubr.bf16.gmra.mrb[24].mxu0 %v2147_v42  ;;  %1433 = vmatmul.mubr.bf16.gmra.mrb[24].mxu1 %v2148_v43 }
 0x17e   : > { %v985_v44 = vpop.f32.mrb[0].mxu0  ;;  %v1374_v45 = vpop.f32.mrb[0].mxu1 }
 0x17f   : > { %v1443_v46 = vmax.f32 %v985_v44, %v1374_v45  ;;  %v987_v47 = vpop.f32.mrb[1].mxu0  ;;  %v1376_v48 = vpop.f32.mrb[1].mxu1 }
 0x180   : > { %v1444_v49 = vmax.f32 %v987_v47, %v1376_v48  ;;  %v989_v50 = vpop.f32.mrb[2].mxu0  ;;  %v1378_v51 = vpop.f32.mrb[2].mxu1 }
 0x181   : > { %v1445_v53 = vmax.f32 %v989_v50, %v1378_v51  ;;  %v991_v54 = vpop.f32.mrb[3].mxu0  ;;  %v1380_v55 = vpop.f32.mrb[3].mxu1 }
 0x182   : > { %v1471_v56 = vmax.f32 %v1443_v46, %v1444_v49  ;;  %v1446_v57 = vmax.f32 %v991_v54, %v1380_v55 }
 0x184   : > { %v1492_v58 = vadd.f32 %v2603_v52, %v1471_v56  ;;  %v1472_v59 = vmax.f32 %v1445_v53, %v1446_v57 }
 0x186   : > { %v1493_v60 = vadd.f32 %v2603_v52, %v1472_v59  ;;  %v995_v61 = vpop.f32.mrb[4].mxu0  ;;  %v1384_v62 = vpop.f32.mrb[4].mxu1  ;;  %v1506_v2 = vmax.f32 %v1492_v58, 0.0 }
 0x187   : > { %v1447_v63 = vmax.f32 %v995_v61, %v1384_v62  ;;  %v997_v0 = vpop.f32.mrb[5].mxu0  ;;  %v1386_v1 = vpop.f32.mrb[5].mxu1 }
 0x188   : > { %v1507_v3 = vmax.f32 %v1493_v60, 0.0  ;;  %v1448_v4 = vmax.f32 %v997_v0, %v1386_v1  ;;  %v999_v5 = vpop.f32.mrb[6].mxu0  ;;  %v1388_v6 = vpop.f32.mrb[6].mxu1 }
 0x189   : > { %v1449_v7 = vmax.f32 %v999_v5, %v1388_v6  ;;  %v1001_v8 = vpop.f32.mrb[7].mxu0  ;;  %v1390_v9 = vpop.f32.mrb[7].mxu1 }
 0x18a   : > { %v1854_v10 = vpack.c.bf16 %v1507_v3, %v1506_v2  ;;  %v1473_v11 = vmax.f32 %v1447_v63, %v1448_v4  ;;  %v1450_v12 = vmax.f32 %v1001_v8, %v1390_v9 }
 0x18c   : > { %1855 = vst [vmem:[%s2610_s26] sm:$0xff] %v1854_v10   ;;  %v1494_v13 = vadd.f32 %v2603_v52, %v1473_v11  ;;  %v1474_v14 = vmax.f32 %v1449_v7, %v1450_v12 }
 0x18e   : > { %v1495_v15 = vadd.f32 %v2603_v52, %v1474_v14  ;;  %v1005_v16 = vpop.f32.mrb[8].mxu0  ;;  %v1394_v17 = vpop.f32.mrb[8].mxu1  ;;  %v1508_v21 = vmax.f32 %v1494_v13, 0.0 }
 0x18f   : > { %v1451_v18 = vmax.f32 %v1005_v16, %v1394_v17  ;;  %v1007_v19 = vpop.f32.mrb[9].mxu0  ;;  %v1396_v20 = vpop.f32.mrb[9].mxu1 }
 0x190   : > { %v1509_v22 = vmax.f32 %v1495_v15, 0.0  ;;  %v1452_v23 = vmax.f32 %v1007_v19, %v1396_v20  ;;  %v1009_v24 = vpop.f32.mrb[10].mxu0  ;;  %v1398_v25 = vpop.f32.mrb[10].mxu1 }
 0x191   : > { %v1453_v26 = vmax.f32 %v1009_v24, %v1398_v25  ;;  %v1011_v27 = vpop.f32.mrb[11].mxu0  ;;  %v1400_v28 = vpop.f32.mrb[11].mxu1 }
 0x192   : > { %v1859_v29 = vpack.c.bf16 %v1509_v22, %v1508_v21  ;;  %v1475_v30 = vmax.f32 %v1451_v18, %v1452_v23  ;;  %v1454_v31 = vmax.f32 %v1011_v27, %v1400_v28 }
 0x194   : > { %1887 = vst [vmem:[%s2610_s26 + $0x8] sm:$0xff] %v1859_v29   ;;  %v1496_v32 = vadd.f32 %v2603_v52, %v1475_v30  ;;  %v1476_v33 = vmax.f32 %v1453_v26, %v1454_v31 }
 0x196   : > { %v1497_v34 = vadd.f32 %v2603_v52, %v1476_v33  ;;  %v1015_v35 = vpop.f32.mrb[12].mxu0  ;;  %v1404_v36 = vpop.f32.mrb[12].mxu1  ;;  %v1510_v40 = vmax.f32 %v1496_v32, 0.0 }
 0x197   : > { %v1455_v37 = vmax.f32 %v1015_v35, %v1404_v36  ;;  %v1017_v38 = vpop.f32.mrb[13].mxu0  ;;  %v1406_v39 = vpop.f32.mrb[13].mxu1 }
 0x198   : > { %v1511_v41 = vmax.f32 %v1497_v34, 0.0  ;;  %v1456_v42 = vmax.f32 %v1017_v38, %v1406_v39  ;;  %v1019_v43 = vpop.f32.mrb[14].mxu0  ;;  %v1408_v44 = vpop.f32.mrb[14].mxu1 }
 0x199   : > { %v1457_v45 = vmax.f32 %v1019_v43, %v1408_v44  ;;  %v1021_v46 = vpop.f32.mrb[15].mxu0  ;;  %v1410_v47 = vpop.f32.mrb[15].mxu1 }
 0x19a   : > { %v1864_v48 = vpack.c.bf16 %v1511_v41, %v1510_v40  ;;  %v1477_v49 = vmax.f32 %v1455_v37, %v1456_v42  ;;  %v1458_v50 = vmax.f32 %v1021_v46, %v1410_v47 }
 0x19c   : > { %1888 = vst [vmem:[%s2610_s26 + $0x10] sm:$0xff] %v1864_v48   ;;  %v1498_v51 = vadd.f32 %v2603_v52, %v1477_v49  ;;  %v1478_v53 = vmax.f32 %v1457_v45, %v1458_v50 }
 0x19e   : > { %v1499_v54 = vadd.f32 %v2603_v52, %v1478_v53  ;;  %v1025_v55 = vpop.f32.mrb[16].mxu0  ;;  %v1414_v56 = vpop.f32.mrb[16].mxu1  ;;  %v1512_v60 = vmax.f32 %v1498_v51, 0.0 }
 0x19f   : > { %v1459_v57 = vmax.f32 %v1025_v55, %v1414_v56  ;;  %v1027_v58 = vpop.f32.mrb[17].mxu0  ;;  %v1416_v59 = vpop.f32.mrb[17].mxu1 }
 0x1a0   : > { %v1513_v61 = vmax.f32 %v1499_v54, 0.0  ;;  %v1460_v62 = vmax.f32 %v1027_v58, %v1416_v59  ;;  %v1029_v63 = vpop.f32.mrb[18].mxu0  ;;  %v1418_v0 = vpop.f32.mrb[18].mxu1 }
 0x1a1   : > { %v1461_v1 = vmax.f32 %v1029_v63, %v1418_v0  ;;  %v1031_v2 = vpop.f32.mrb[19].mxu0  ;;  %v1420_v3 = vpop.f32.mrb[19].mxu1 }
 0x1a2   : > { %v1869_v4 = vpack.c.bf16 %v1513_v61, %v1512_v60  ;;  %v1479_v5 = vmax.f32 %v1459_v57, %v1460_v62  ;;  %v1462_v6 = vmax.f32 %v1031_v2, %v1420_v3 }
 0x1a4   : > { %1889 = vst [vmem:[%s2610_s26 + $0x18] sm:$0xff] %v1869_v4   ;;  %v1500_v7 = vadd.f32 %v2603_v52, %v1479_v5  ;;  %v1480_v8 = vmax.f32 %v1461_v1, %v1462_v6 }
 0x1a6   : > { %v1501_v9 = vadd.f32 %v2603_v52, %v1480_v8  ;;  %v1035_v10 = vpop.f32.mrb[20].mxu0  ;;  %v1424_v11 = vpop.f32.mrb[20].mxu1  ;;  %v1514_v15 = vmax.f32 %v1500_v7, 0.0 }
 0x1a7   : > { %v1463_v12 = vmax.f32 %v1035_v10, %v1424_v11  ;;  %v1037_v13 = vpop.f32.mrb[21].mxu0  ;;  %v1426_v14 = vpop.f32.mrb[21].mxu1 }
 0x1a8   : > { %v1515_v16 = vmax.f32 %v1501_v9, 0.0  ;;  %v1464_v17 = vmax.f32 %v1037_v13, %v1426_v14  ;;  %v1039_v18 = vpop.f32.mrb[22].mxu0  ;;  %v1428_v19 = vpop.f32.mrb[22].mxu1 }
 0x1a9   : > { %v1465_v20 = vmax.f32 %v1039_v18, %v1428_v19  ;;  %v1041_v21 = vpop.f32.mrb[23].mxu0  ;;  %v1430_v22 = vpop.f32.mrb[23].mxu1 }
 0x1aa   : > { %v1874_v23 = vpack.c.bf16 %v1515_v16, %v1514_v15  ;;  %v1481_v24 = vmax.f32 %v1463_v12, %v1464_v17  ;;  %v1466_v25 = vmax.f32 %v1041_v21, %v1430_v22 }
 0x1ac   : > { %1890 = vst [vmem:[%s2610_s26 + $0x20] sm:$0xff] %v1874_v23   ;;  %v1502_v26 = vadd.f32 %v2603_v52, %v1481_v24  ;;  %v1482_v27 = vmax.f32 %v1465_v20, %v1466_v25 }
 0x1ae   : > { %v1503_v28 = vadd.f32 %v2603_v52, %v1482_v27  ;;  %v1045_v29 = vpop.f32.mrb[24].mxu0  ;;  %v1434_v30 = vpop.f32.mrb[24].mxu1  ;;  %v1516_v34 = vmax.f32 %v1502_v26, 0.0 }
 0x1af   : > { %v1467_v31 = vmax.f32 %v1045_v29, %v1434_v30  ;;  %v1047_v32 = vpop.f32.mrb[25].mxu0  ;;  %v1436_v33 = vpop.f32.mrb[25].mxu1 }
 0x1b0   : > { %v1517_v35 = vmax.f32 %v1503_v28, 0.0  ;;  %v1468_v36 = vmax.f32 %v1047_v32, %v1436_v33  ;;  %v1049_v37 = vpop.f32.mrb[26].mxu0  ;;  %v1438_v38 = vpop.f32.mrb[26].mxu1 }
 0x1b1   : > { %v1469_v39 = vmax.f32 %v1049_v37, %v1438_v38  ;;  %v1051_v40 = vpop.f32.mrb[27].mxu0  ;;  %v1440_v41 = vpop.f32.mrb[27].mxu1 }
 0x1b2   : > { %v1879_v42 = vpack.c.bf16 %v1517_v35, %v1516_v34  ;;  %v1483_v43 = vmax.f32 %v1467_v31, %v1468_v36  ;;  %v1470_v44 = vmax.f32 %v1051_v40, %v1440_v41 }
 0x1b4   : > { %1891 = vst [vmem:[%s2610_s26 + $0x28] sm:$0xff] %v1879_v42   ;;  %v1504_v45 = vadd.f32 %v2603_v52, %v1483_v43  ;;  %v1484_v46 = vmax.f32 %v1469_v39, %v1470_v44 }
 0x1b6   : > { %v1505_v47 = vadd.f32 %v2603_v52, %v1484_v46  ;;  %v1518_v48 = vmax.f32 %v1504_v45, 0.0 }
 0x1b8   : > { %v1519_v49 = vmax.f32 %v1505_v47, 0.0 }
 0x1ba   : > { %v1884_v50 = vpack.c.bf16 %v1519_v49, %v1518_v48 }
 0x1bc   : > { %1892 = vst [vmem:[%s2610_s26 + $0x30] sm:$0xff] %v1884_v50  }
 0x1bd PF: > { %p10_p9 = scmp.ge.s32.totalorder %s2210_s16, 4   ;;  %s2645_s12 = smov %s2167_s13 }
 0x1be   : > { %s2646_s13 = smov %s2219_s19  ;;  %s2647_s14 = smov %s2210_s16 }
 0x1bf   :  { %12 = sbr.rel (!%p10_p9) target bundleno = 2 (0x2), region = 91 }

// kernel: cnn_cifar_forward.3
= control target key start
LH: loop header
LB: loop body
LE: loop exit
PB: predicated region body
PF: predicated region fallthrough
CT: control target
= control target key end

     0   :  { %s3169_s30 = smov 0   ;;  %s3171_s10 = smov 0   ;;  %s3808_s0 = inlined_call_operand.vmem [shape: bf16[2,80,640], index: 0, kind: input, shape index: {}]   ;;  %s3809_s1 = inlined_call_operand.vmem [shape: bf16[640,256], index: 1, kind: input, shape index: {}]   ;;  %s3810_s2 = inlined_call_operand.vmem [shape: f32[1,128], index: 2, kind: input, shape index: {}]   ;;  %s3811_s3 = inlined_call_operand.vmem [shape: bf16[5,128,128], index: 3, kind: input, shape index: {}]   ;;  %s3812_s4 = inlined_call_operand.vmem [shape: f32[1,128], index: 4, kind: input, shape index: {}]   ;;  %s3813_s5 = inlined_call_operand.vmem [shape: bf16[128,128], index: 5, kind: input, shape index: {}]   ;;  %s3814_s6 = inlined_call_operand.vmem [shape: f32[1,128], index: 6, kind: input, shape index: {}]   ;;  %s3815_s7 = inlined_call_operand.vmem [shape: bf16[128,128], index: 7, kind: input, shape index: {}]   ;;  %s3816_s8 = inlined_call_operand.vmem [shape: f32[1,128], index: 8, kind: input, shape index: {}]   ;;  %s3817_s9 = inlined_call_operand.vmem [shape: f32[16,128], index: 9, kind: output, shape index: {}]  }
   0x1   :  { %s3173_s11 = smov 0  }
   0x2 LB: > { %s2314_s12 = sadd.s32 4294967295, %s3114_s11   ;;  %s3186_s13 = sadd.s32 1, %s3114_s11   ;;  %s3114_s11 = sphi %s3173_s11, %s3820_s11   ;;  %s3110_s10 = sphi %s3171_s10, %s3819_s10   ;;  %s3106_s30 = sphi %s3169_s30, %s3818_s30  }
   0x3   : > { %s23_s14 = ssub.s32 %s3114_s11, %s3186_s13  ;;  %s26_s15 = sadd.s32 1, %s3110_s10 }
   0x4   : > { %p24_p0 = scmp.eq.s32.totalorder %s23_s14, 0  ;;  %p33_p1 = scmp.ne.s32.totalorder %s3110_s10, %s3106_s30 }
   0x5   : > { %p34_p2 = scmp.eq.s32.totalorder %s3114_s11, 0  ;;  %p2317_p4 = scmp.ge.s32.totalorder %s3114_s11, 2 }
   0x6   : > { %s3195_s16 = scalar_select %p24_p0, %s3110_s10, %s26_s15  }
   0x7   : > { %p35_p3 = por %p34_p2, %p33_p1  ;;  %277 = sbr.rel (%p2317_p4) target bundleno = 36 (0x24), region = 48 }
   0xe   : > { %280 = sbr.rel (!%p35_p3) target bundleno = 36 (0x24), region = 52  ;;  %s282_s17 = sand.u32 (%p35_p3), 1, %s3110_s10  }
   0xf   : > { %s2843_s18 = smul.u32 (%p35_p3), 200, %s282_s17 }
  0x10   : > { %s2846_s19 = smul.u32 (%p35_p3), 100, %s3114_s11 }
  0x11   : > { %s3208_s23 = scalar_lea.vmem (%p35_p3), [#allocation2], %s2843_s18 }
  0x12   : > { %s3203_s22 = scalar_lea.vmem (%p35_p3), %s3808_s0, %s2846_s19 }
  0x13   : > { %v303_v0 = vld [vmem:[%s3203_s22] sm:$0xff] (%p35_p3)  ;;  %v305_v1 = vld [vmem:[%s3203_s22 + $0x8] sm:$0xff] (%p35_p3)  ;;  %v307_v2 = vld [vmem:[%s3203_s22 + $0x14] sm:$0xff] (%p35_p3) }
  0x14   : > { %304 = vst [vmem:[%s3208_s23] sm:$0xff] (%p35_p3), %v303_v0  ;;  %306 = vst [vmem:[%s3208_s23 + $0x8] sm:$0xff] (%p35_p3), %v305_v1  ;;  %v309_v3 = vld [vmem:[%s3203_s22 + $0x1c] sm:$0xff] (%p35_p3)  ;;  %v311_v4 = vld [vmem:[%s3203_s22 + $0x28] sm:$0xff] (%p35_p3) }
  0x15   : > { %308 = vst [vmem:[%s3208_s23 + $0x14] sm:$0xff] %v307_v2  ;;  %v313_v5 = vld [vmem:[%s3203_s22 + $0x30] sm:$0xff]  ;;  %310 = vst [vmem:[%s3208_s23 + $0x1c] sm:$0xff] %v309_v3  ;;  %v315_v6 = vld [vmem:[%s3203_s22 + $0x3c] sm:$0xff] }
  0x16   : > { %312 = vst [vmem:[%s3208_s23 + $0x28] sm:$0xff] %v311_v4  ;;  %314 = vst [vmem:[%s3208_s23 + $0x30] sm:$0xff] %v313_v5  ;;  %v317_v7 = vld [vmem:[%s3203_s22 + $0x44] sm:$0xff]  ;;  %v319_v8 = vld [vmem:[%s3203_s22 + $0x50] sm:$0xff] }
  0x17   : > { %316 = vst [vmem:[%s3208_s23 + $0x3c] sm:$0xff] %v315_v6  ;;  %318 = vst [vmem:[%s3208_s23 + $0x44] sm:$0xff] %v317_v7  ;;  %v321_v9 = vld [vmem:[%s3203_s22 + $0x58] sm:$0xff]  ;;  %v323_v10 = vld [vmem:[%s3203_s22 + $0xc8] sm:$0xff] }
  0x18   : > { %320 = vst [vmem:[%s3208_s23 + $0x50] sm:$0xff] %v319_v8  ;;  %v325_v11 = vld [vmem:[%s3203_s22 + $0xd0] sm:$0xff]  ;;  %322 = vst [vmem:[%s3208_s23 + $0x58] sm:$0xff] %v321_v9  ;;  %v327_v12 = vld [vmem:[%s3203_s22 + $0xdc] sm:$0xff] }
  0x19   : > { %324 = vst [vmem:[%s3208_s23 + $0x64] sm:$0xff] %v323_v10  ;;  %326 = vst [vmem:[%s3208_s23 + $0x6c] sm:$0xff] %v325_v11  ;;  %v329_v13 = vld [vmem:[%s3203_s22 + $0xe4] sm:$0xff]  ;;  %v331_v14 = vld [vmem:[%s3203_s22 + $0xf0] sm:$0xff] }
  0x1a   : > { %328 = vst [vmem:[%s3208_s23 + $0x78] sm:$0xff] %v327_v12  ;;  %330 = vst [vmem:[%s3208_s23 + $0x80] sm:$0xff] %v329_v13  ;;  %v333_v15 = vld [vmem:[%s3203_s22 + $0xf8] sm:$0xff]  ;;  %v335_v16 = vld [vmem:[%s3203_s22 + $0x104] sm:$0xff] }
  0x1b   : > { %332 = vst [vmem:[%s3208_s23 + $0x8c] sm:$0xff] %v331_v14  ;;  %v337_v17 = vld [vmem:[%s3203_s22 + $0x10c] sm:$0xff]  ;;  %334 = vst [vmem:[%s3208_s23 + $0x94] sm:$0xff] %v333_v15  ;;  %v339_v18 = vld [vmem:[%s3203_s22 + $0x118] sm:$0xff] }
  0x1c   : > { %336 = vst [vmem:[%s3208_s23 + $0xa0] sm:$0xff] %v335_v16  ;;  %338 = vst [vmem:[%s3208_s23 + $0xa8] sm:$0xff] %v337_v17  ;;  %v341_v19 = vld [vmem:[%s3203_s22 + $0x120] sm:$0xff]  ;;  %v2319_v20 = vld [vmem:[%s3203_s22 + $0x10] sm:$0xf] }
  0x1d   : > { %340 = vst [vmem:[%s3208_s23 + $0xb4] sm:$0xff] %v339_v18  ;;  %342 = vst [vmem:[%s3208_s23 + $0xbc] sm:$0xff] %v341_v19  ;;  %v2321_v21 = vld [vmem:[%s3203_s22 + $0x24] sm:$0xf]  ;;  %v2323_v22 = vld [vmem:[%s3203_s22 + $0x38] sm:$0xf] }
  0x1e   : > { %2320 = vst [vmem:[%s3208_s23 + $0x10] sm:$0xf] %v2319_v20  ;;  %v2325_v23 = vld [vmem:[%s3203_s22 + $0x4c] sm:$0xf]  ;;  %2322 = vst [vmem:[%s3208_s23 + $0x24] sm:$0xf] %v2321_v21 }
  0x1f   : > { %2324 = vst [vmem:[%s3208_s23 + $0x38] sm:$0xf] %v2323_v22  ;;  %2326 = vst [vmem:[%s3208_s23 + $0x4c] sm:$0xf] %v2325_v23  ;;  %v2327_v24 = vld [vmem:[%s3203_s22 + $0x60] sm:$0xf] }
  0x20   : > { %v2329_v25 = vld [vmem:[%s3203_s22 + $0xd8] sm:$0xf]  ;;  %v2331_v26 = vld [vmem:[%s3203_s22 + $0xec] sm:$0xf]  ;;  %2328 = vst [vmem:[%s3208_s23 + $0x60] sm:$0xf] %v2327_v24 }
  0x21   : > { %2330 = vst [vmem:[%s3208_s23 + $0x74] sm:$0xf] %v2329_v25  ;;  %2332 = vst [vmem:[%s3208_s23 + $0x88] sm:$0xf] %v2331_v26  ;;  %v2333_v27 = vld [vmem:[%s3203_s22 + $0x100] sm:$0xf] }
  0x22   : > { %v2335_v28 = vld [vmem:[%s3203_s22 + $0x114] sm:$0xf]  ;;  %v2337_v29 = vld [vmem:[%s3203_s22 + $0x128] sm:$0xf]  ;;  %2334 = vst [vmem:[%s3208_s23 + $0x9c] sm:$0xf] %v2333_v27 }
  0x23   : > { %2336 = vst [vmem:[%s3208_s23 + $0xb0] sm:$0xf] %v2335_v28  ;;  %2338 = vst [vmem:[%s3208_s23 + $0xc4] sm:$0xf] %v2337_v29 }
  0x24 PF: > { %p2339_p5 = scmp.ge.s32.totalorder %s3114_s11, 1  ;;  %p374_p6 = scmp.lt.s32.totalorder %s3114_s11, 3 }
  0x26   : > { %p375_p7 = pnand %p2339_p5, %p374_p6 }
  0x27   : > { %v2874_v30 = vld [vmem:[%s3809_s1 + $0x4] ss:$8 sps:$4 sm:$0xff] (!%p375_p7)   ;;  %v2876_v31 = vld [vmem:[%s3809_s1] ss:$8 sps:$4 sm:$0xff] (!%p375_p7)   ;;  %v2877_v32 = vld [vmem:[%s3809_s1 + $0x14] ss:$8 sps:$4 sm:$0xff] (!%p375_p7)  }
  0x28   : > { %378 = sbr.rel (%p375_p7) target bundleno = 1458 (0x5b2), region = 78  ;;  %986 = vmatprep.subr.bf16.mxu0 (!%p375_p7), %v2874_v30  ;;  %1255 = vmatprep.subr.bf16.mxu1 (!%p375_p7), %v2874_v30  ;;  %v2879_v33 = vld [vmem:[%s3809_s1 + $0x10] ss:$8 sps:$4 sm:$0xff] (!%p375_p7)   ;;  %v2880_v34 = vld [vmem:[%s3809_s1 + $0x24] ss:$8 sps:$4 sm:$0xff] (!%p375_p7)   ;;  %s381_s27 = sand.u32 (!%p375_p7), 1, %s3106_s30  }
  0x29   : > { %987 = vmatpush1.bf16.msra.mxu0 (!%p375_p7), %v2876_v31  ;;  %1256 = vmatpush1.bf16.msra.mxu1 (!%p375_p7), %v2876_v31  ;;  %v2882_v35 = vld [vmem:[%s3809_s1 + $0x20] ss:$8 sps:$4 sm:$0xff] (!%p375_p7)   ;;  %v2883_v36 = vld [vmem:[%s3809_s1 + $0x34] ss:$8 sps:$4 sm:$0xff] (!%p375_p7)   ;;  %v2885_v37 = vld [vmem:[%s3809_s1 + $0x30] ss:$8 sps:$4 sm:$0xff] (!%p375_p7)  }
  0x2a   : > { %988 = vmatprep.subr.bf16.mxu0 (!%p375_p7), %v2877_v32  ;;  %1257 = vmatprep.subr.bf16.mxu1 (!%p375_p7), %v2877_v32  ;;  %v2886_v38 = vld [vmem:[%s3809_s1 + $0x44] ss:$8 sps:$4 sm:$0xff] (!%p375_p7)   ;;  %v2888_v39 = vld [vmem:[%s3809_s1 + $0x40] ss:$8 sps:$4 sm:$0xff] (!%p375_p7)   ;;  %s2845_s14 = smul.u32 (!%p375_p7), 200, %s381_s27  ;;  %vm3118_vm0 = vmmov (!%p375_p7), 0  }
  0x2b   : > { %v2889_v40 = vld [vmem:[%s3809_s1 + $0x54] ss:$8 sps:$4 sm:$0xff] (!%p375_p7)   ;;  %v2891_v41 = vld [vmem:[%s3809_s1 + $0x50] ss:$8 sps:$4 sm:$0xff] (!%p375_p7)   ;;  %v2892_v42 = vld [vmem:[%s3809_s1 + $0x64] ss:$8 sps:$4 sm:$0xff] (!%p375_p7)  }
  0x2c   : > { %s3309_s21 = scalar_lea.vmem (!%p375_p7), [#allocation2], %s2845_s14  ;;  %v2894_v44 = vld [vmem:[%s3809_s1 + $0x60] ss:$8 sps:$4 sm:$0xff] (!%p375_p7)   ;;  %v2895_v45 = vld [vmem:[%s3809_s1 + $0x74] ss:$8 sps:$4 sm:$0xff] (!%p375_p7)   ;;  %p416_p8 = scmp.lt.s32.totalorder (!%p375_p7), %s2314_s12, 1 }
  0x2d   : > { %989 = vmatpush1.bf16.msra.mxu0 (!%p375_p7), %v2879_v33  ;;  %1258 = vmatpush1.bf16.msra.mxu1 (!%p375_p7), %v2879_v33  ;;  %v2924_v43 = vld [vmem:[%s3309_s21 + $0x4] ss:$20 sps:$4 sm:$0xff] (!%p375_p7)   ;;  %v2930_v46 = vld [vmem:[%s3309_s21 + $0x68] ss:$20 sps:$4 sm:$0xff] (!%p375_p7)   ;;  %v2922_v1 = vld [vmem:[%s3309_s21] ss:$20 sps:$4 sm:$0xff] (!%p375_p7)  }
  0x2e   : > { %990 = vmatprep.subr.bf16.mxu0 (!%p375_p7), %v2880_v34  ;;  %1259 = vmatprep.subr.bf16.mxu1 (!%p375_p7), %v2880_v34  ;;  %v2897_v47 = vld [vmem:[%s3809_s1 + $0x70] ss:$8 sps:$4 sm:$0xff] (!%p375_p7)   ;;  %v2898_v48 = vld [vmem:[%s3809_s1 + $0x84] ss:$8 sps:$4 sm:$0xff] (!%p375_p7)   ;;  %v2900_v49 = vld [vmem:[%s3809_s1 + $0x80] ss:$8 sps:$4 sm:$0xff] (!%p375_p7)  }
  0x2f   : > { %1018 = vmatprep.mubr.bf16.mxu0 %v2924_v43  ;;  %1287 = vmatprep.mubr.bf16.mxu1 %v2930_v46  ;;  %v2901_v50 = vld [vmem:[%s3809_s1 + $0x94] ss:$8 sps:$4 sm:$0xff]   ;;  %v2903_v51 = vld [vmem:[%s3809_s1 + $0x90] ss:$8 sps:$4 sm:$0xff]   ;;  %v2904_v52 = vld [vmem:[%s3809_s1 + $0xa4] ss:$8 sps:$4 sm:$0xff]  }
  0x30   : > { %v2906_v53 = vld [vmem:[%s3809_s1 + $0xa0] ss:$8 sps:$4 sm:$0xff]   ;;  %v2907_v54 = vld [vmem:[%s3809_s1 + $0xb4] ss:$8 sps:$4 sm:$0xff]   ;;  %v2909_v55 = vld [vmem:[%s3809_s1 + $0xb0] ss:$8 sps:$4 sm:$0xff]  }
  0x31   : > { %991 = vmatpush1.bf16.msra.mxu0 %v2882_v35  ;;  %1260 = vmatpush1.bf16.msra.mxu1 %v2882_v35  ;;  %v2910_v56 = vld [vmem:[%s3809_s1 + $0xc4] ss:$8 sps:$4 sm:$0xff]   ;;  %v2912_v57 = vld [vmem:[%s3809_s1 + $0xc0] ss:$8 sps:$4 sm:$0xff]   ;;  %v2913_v58 = vld [vmem:[%s3809_s1 + $0xd4] ss:$8 sps:$4 sm:$0xff]  }
  0x32   : > { %992 = vmatprep.subr.bf16.mxu0 %v2883_v36  ;;  %1261 = vmatprep.subr.bf16.mxu1 %v2883_v36  ;;  %v2915_v59 = vld [vmem:[%s3809_s1 + $0xd0] ss:$8 sps:$4 sm:$0xff]   ;;  %v2916_v60 = vld [vmem:[%s3809_s1 + $0xe4] ss:$8 sps:$4 sm:$0xff]   ;;  %v2918_v61 = vld [vmem:[%s3809_s1 + $0xe0] ss:$8 sps:$4 sm:$0xff]  }
  0x33   : > { %v2919_v62 = vld [vmem:[%s3809_s1 + $0xf4] ss:$8 sps:$4 sm:$0xff]   ;;  %v2921_v63 = vld [vmem:[%s3809_s1 + $0xf0] ss:$8 sps:$4 sm:$0xff]   ;;  %v2927_v0 = vld [vmem:[%s3809_s1 + $0x104] ss:$8 sps:$4 sm:$0xff]  }
  0x34   : > { %v2928_v2 = vld [vmem:[%s3309_s21 + $0x64] ss:$20 sps:$4 sm:$0xff]   ;;  %v2933_v4 = vld [vmem:[%s3809_s1 + $0x114] ss:$8 sps:$4 sm:$0xff]   ;;  %s3822_s12 = smov (!%p416_p8, %s2314_s12), 1 }
  0x35   : > { %993 = vmatpush1.bf16.msra.mxu0 %v2885_v37  ;;  %1262 = vmatpush1.bf16.msra.mxu1 %v2885_v37  ;;  %v2925_v3 = vld [vmem:[%s3809_s1 + $0x100] ss:$8 sps:$4 sm:$0xff]   ;;  %v2969_v6 = vld [vmem:[%s3309_s21 + $0x90] ss:$20 sps:$4 sm:$0xff]   ;;  %v2939_v14 = vld [vmem:[%s3809_s1 + $0x134] ss:$8 sps:$4 sm:$0xff]  }
  0x36   : > { %994 = vmatprep.subr.bf16.mxu0 %v2886_v38  ;;  %1263 = vmatprep.subr.bf16.mxu1 %v2886_v38  ;;  %v2964_v5 = vld [vmem:[%s3309_s21 + $0x2c] ss:$20 sps:$4 sm:$0xff]   ;;  %v2931_v7 = vld [vmem:[%s3809_s1 + $0x110] ss:$8 sps:$4 sm:$0xff]   ;;  %s2340_s29 = sshll.u32 %s3822_s12, 3 }
  0x37   : > { %v2936_v8 = vld [vmem:[%s3809_s1 + $0x124] ss:$8 sps:$4 sm:$0xff]   ;;  %v513_v11 = vld [vmem:[%s3309_s21 + $0x50] sm:$0xff]  ;;  %v2934_v13 = vld [vmem:[%s3809_s1 + $0x120] ss:$8 sps:$4 sm:$0xff]   ;;  %s419_s17 = scalar_lea.vmem %s3817_s9, %s2340_s29 }
  0x38   : > { %v2971_v9 = vld [vmem:[%s3309_s21 + $0x28] ss:$20 sps:$4 sm:$0xff]   ;;  %v2972_v10 = vld [vmem:[%s3309_s21 + $0x8c] ss:$20 sps:$4 sm:$0xff]   ;;  %v2448_v12 = vld [vmem:[%s3309_s21 + $0xb4] sm:$0xff]  ;;  %v2352_v15 = vcombine.high %v513_v11, %v513_v11  ;;  %v2351_v21 = vcombine.low %v513_v11, %v513_v11 }
  0x39   : > { %995 = vmatpush1.bf16.msra.mxu0 %v2888_v39  ;;  %1264 = vmatpush1.bf16.msra.mxu1 %v2888_v39  ;;  %v2462_v16 = vcombine.high %v2448_v12, %v2448_v12  ;;  %v2937_v17 = vld [vmem:[%s3809_s1 + $0x130] ss:$8 sps:$4 sm:$0xff]   ;;  %v2942_v18 = vld [vmem:[%s3809_s1 + $0x144] ss:$8 sps:$4 sm:$0xff]   ;;  %v2940_v19 = vld [vmem:[%s3809_s1 + $0x140] ss:$8 sps:$4 sm:$0xff]   ;;  %v2461_v22 = vcombine.low %v2448_v12, %v2448_v12 }
  0x3a   : > { %996 = vmatprep.subr.bf16.mxu0 %v2889_v40  ;;  %1265 = vmatprep.subr.bf16.mxu1 %v2889_v40  ;;  %v2945_v20 = vld [vmem:[%s3809_s1 + $0x154] ss:$8 sps:$4 sm:$0xff]   ;;  %v2994_v24 = vld [vmem:[%s3309_s21 + $0x70] ss:$20 sps:$4 sm:$0xff]   ;;  %v2946_v27 = vld [vmem:[%s3809_s1 + $0x160] ss:$8 sps:$4 sm:$0xff]  }
  0x3b   : > { %v2988_v23 = vld [vmem:[%s3309_s21 + $0xc] ss:$20 sps:$4 sm:$0xff]   ;;  %v2943_v25 = vld [vmem:[%s3809_s1 + $0x150] ss:$8 sps:$4 sm:$0xff]  }
  0x3c   : > { %v2948_v26 = vld [vmem:[%s3809_s1 + $0x164] ss:$8 sps:$4 sm:$0xff]   ;;  %v2951_v28 = vld [vmem:[%s3809_s1 + $0x174] ss:$8 sps:$4 sm:$0xff]   ;;  %v2949_v29 = vld [vmem:[%s3809_s1 + $0x170] ss:$8 sps:$4 sm:$0xff]  }
  0x3d   : > { %997 = vmatpush1.bf16.msra.mxu0 %v2891_v41  ;;  %1266 = vmatpush1.bf16.msra.mxu1 %v2891_v41  ;;  %v2954_v30 = vld [vmem:[%s3809_s1 + $0x184] ss:$8 sps:$4 sm:$0xff]   ;;  %v2952_v31 = vld [vmem:[%s3809_s1 + $0x180] ss:$8 sps:$4 sm:$0xff]   ;;  %v2957_v32 = vld [vmem:[%s3809_s1 + $0x194] ss:$8 sps:$4 sm:$0xff]  }
  0x3e   : > { %998 = vmatprep.subr.bf16.mxu0 %v2892_v42  ;;  %1267 = vmatprep.subr.bf16.mxu1 %v2892_v42  ;;  %v2955_v33 = vld [vmem:[%s3809_s1 + $0x190] ss:$8 sps:$4 sm:$0xff]   ;;  %v2960_v34 = vld [vmem:[%s3809_s1 + $0x1a4] ss:$8 sps:$4 sm:$0xff]   ;;  %v2958_v35 = vld [vmem:[%s3809_s1 + $0x1a0] ss:$8 sps:$4 sm:$0xff]  }
  0x3f   : > { %v2963_v36 = vld [vmem:[%s3809_s1 + $0x1b4] ss:$8 sps:$4 sm:$0xff]   ;;  %v2961_v37 = vld [vmem:[%s3809_s1 + $0x1b0] ss:$8 sps:$4 sm:$0xff]   ;;  %v2968_v38 = vld [vmem:[%s3809_s1 + $0x1c4] ss:$8 sps:$4 sm:$0xff]  }
  0x40   : > { %v2966_v39 = vld [vmem:[%s3809_s1 + $0x1c0] ss:$8 sps:$4 sm:$0xff]   ;;  %v2975_v40 = vld [vmem:[%s3809_s1 + $0x1d4] ss:$8 sps:$4 sm:$0xff]   ;;  %v2973_v41 = vld [vmem:[%s3809_s1 + $0x1d0] ss:$8 sps:$4 sm:$0xff]  }
  0x41   : > { %999 = vmatpush1.bf16.msra.mxu0 %v2894_v44  ;;  %1268 = vmatpush1.bf16.msra.mxu1 %v2894_v44  ;;  %v2979_v42 = vld [vmem:[%s3809_s1 + $0x1e4] ss:$8 sps:$4 sm:$0xff]   ;;  %v2977_v43 = vld [vmem:[%s3809_s1 + $0x1e0] ss:$8 sps:$4 sm:$0xff]   ;;  %v2985_v44 = vld [vmem:[%s3809_s1 + $0x1f4] ss:$8 sps:$4 sm:$0xff]  }
  0x42   : > { %1000 = vmatprep.subr.bf16.mxu0 %v2895_v45  ;;  %1269 = vmatprep.subr.bf16.mxu1 %v2895_v45  ;;  %v2983_v45 = vld [vmem:[%s3809_s1 + $0x1f0] ss:$8 sps:$4 sm:$0xff]   ;;  %v2991_v46 = vld [vmem:[%s3809_s1 + $0x204] ss:$8 sps:$4 sm:$0xff]  }
  0x43   : > { %v3026_v11 = vld [vmem:[%s3309_s21 + $0x10] ss:$20 sps:$4 sm:$0xff]   ;;  %v3027_v12 = vld [vmem:[%s3309_s21 + $0x74] ss:$20 sps:$4 sm:$0xff]  }
  0x45   : > { %1001 = vmatpush1.bf16.msra.mxu0 %v2897_v47  ;;  %1270 = vmatpush1.bf16.msra.mxu1 %v2897_v47  ;;  %v2986_v47 = vld [vmem:[%s3309_s21 + $0x8] ss:$20 sps:$4 sm:$0xff]  }
  0x46   : > { %1002 = vmatprep.subr.bf16.mxu0 %v2898_v48  ;;  %1271 = vmatprep.subr.bf16.mxu1 %v2898_v48  ;;  %v2992_v48 = vld [vmem:[%s3309_s21 + $0x6c] ss:$20 sps:$4 sm:$0xff]  }
  0x49   : > { %1003 = vmatpush1.bf16.msra.mxu0 %v2900_v49  ;;  %1272 = vmatpush1.bf16.msra.mxu1 %v2900_v49  ;;  %v2989_v49 = vld [vmem:[%s3809_s1 + $0x200] ss:$8 sps:$4 sm:$0xff]  }
  0x4a   : > { %1004 = vmatprep.subr.bf16.mxu0 %v2901_v50  ;;  %1273 = vmatprep.subr.bf16.mxu1 %v2901_v50  ;;  %v2997_v50 = vld [vmem:[%s3809_s1 + $0x214] ss:$8 sps:$4 sm:$0xff]  }
  0x4d   : > { %1005 = vmatpush1.bf16.msra.mxu0 %v2903_v51  ;;  %1274 = vmatpush1.bf16.msra.mxu1 %v2903_v51  ;;  %v3004_v51 = vld [vmem:[%s3309_s21 + $0x34] ss:$20 sps:$4 sm:$0xff]  }
  0x4e   : > { %1006 = vmatprep.subr.bf16.mxu0 %v2904_v52  ;;  %1275 = vmatprep.subr.bf16.mxu1 %v2904_v52  ;;  %v3006_v52 = vld [vmem:[%s3309_s21 + $0x98] ss:$20 sps:$4 sm:$0xff]  }
  0x51   : > { %1007 = vmatpush1.bf16.msra.mxu0 %v2906_v53  ;;  %1276 = vmatpush1.bf16.msra.mxu1 %v2906_v53  ;;  %v2995_v53 = vld [vmem:[%s3809_s1 + $0x210] ss:$8 sps:$4 sm:$0xff]  }
  0x52   : > { %1008 = vmatprep.subr.bf16.mxu0 %v2907_v54  ;;  %1277 = vmatprep.subr.bf16.mxu1 %v2907_v54  ;;  %v3000_v54 = vld [vmem:[%s3809_s1 + $0x224] ss:$8 sps:$4 sm:$0xff]  }
  0x55   : > { %1009 = vmatpush1.bf16.msra.mxu0 %v2909_v55  ;;  %1278 = vmatpush1.bf16.msra.mxu1 %v2909_v55  ;;  %v3008_v55 = vld [vmem:[%s3309_s21 + $0x30] ss:$20 sps:$4 sm:$0xff]  }
  0x56   : > { %1010 = vmatprep.subr.bf16.mxu0 %v2910_v56  ;;  %1279 = vmatprep.subr.bf16.mxu1 %v2910_v56  ;;  %v3012_v56 = vld [vmem:[%s3309_s21 + $0x94] ss:$20 sps:$4 sm:$0xff]  }
  0x59   : > { %1011 = vmatpush1.bf16.msra.mxu0 %v2912_v57  ;;  %1280 = vmatpush1.bf16.msra.mxu1 %v2912_v57  ;;  %v514_v57 = vld [vmem:[%s3309_s21 + $0x58] sm:$0xff] }
  0x5a   : > { %1012 = vmatprep.subr.bf16.mxu0 %v2913_v58  ;;  %1281 = vmatprep.subr.bf16.mxu1 %v2913_v58  ;;  %v2449_v58 = vld [vmem:[%s3309_s21 + $0xbc] sm:$0xff] }
  0x5d   : > { %1013 = vmatpush1.bf16.msra.mxu0 %v2915_v59  ;;  %1282 = vmatpush1.bf16.msra.mxu1 %v2915_v59  ;;  %v2998_v59 = vld [vmem:[%s3809_s1 + $0x220] ss:$8 sps:$4 sm:$0xff]  }
  0x5e   : > { %1014 = vmatprep.subr.bf16.mxu0 %v2916_v60  ;;  %1283 = vmatprep.subr.bf16.mxu1 %v2916_v60  ;;  %v3003_v60 = vld [vmem:[%s3809_s1 + $0x234] ss:$8 sps:$4 sm:$0xff]  }
  0x61   : > { %1015 = vmatpush1.bf16.msra.mxu0 %v2918_v61  ;;  %1284 = vmatpush1.bf16.msra.mxu1 %v2918_v61  ;;  %v2354_v61 = vcombine.high %v514_v57, %v514_v57 }
  0x62   : > { %1016 = vmatprep.subr.bf16.mxu0 %v2919_v62  ;;  %1285 = vmatprep.subr.bf16.mxu1 %v2919_v62  ;;  %v2464_v62 = vcombine.high %v2449_v58, %v2449_v58 }
  0x65   : > { %1017 = vmatpush1.bf16.msra.mxu0 %v2921_v63  ;;  %1286 = vmatpush1.bf16.msra.mxu1 %v2921_v63  ;;  %v3001_v63 = vld [vmem:[%s3809_s1 + $0x230] ss:$8 sps:$4 sm:$0xff]  }
  0x66   : > { %1047 = vmatprep.subr.bf16.mxu0 %v2927_v0  ;;  %1316 = vmatprep.subr.bf16.mxu1 %v2927_v0  ;;  %v3011_v0 = vld [vmem:[%s3809_s1 + $0x244] ss:$8 sps:$4 sm:$0xff]  }
  0x68   : > { %1019 = vmatmul.mubr.bf16.vlgmr.msra.gmra.mrb[0].mxu0 %v2922_v1  ;;  %1288 = vmatmul.mubr.bf16.vlgmr.msra.gmra.mrb[0].mxu1 %v2928_v2  ;;  %v2353_v1 = vcombine.low %v514_v57, %v514_v57  ;;  %v2463_v2 = vcombine.low %v2449_v58, %v2449_v58 }
  0x69   : > { %1048 = vmatpush1.bf16.msra.mxu0 %v2925_v3  ;;  %1317 = vmatpush1.bf16.msra.mxu1 %v2925_v3  ;;  %v3009_v3 = vld [vmem:[%s3809_s1 + $0x240] ss:$8 sps:$4 sm:$0xff]  }
  0x6a   : > { %1049 = vmatprep.subr.bf16.mxu0 %v2933_v4  ;;  %1318 = vmatprep.subr.bf16.mxu1 %v2933_v4  ;;  %v3015_v4 = vld [vmem:[%s3809_s1 + $0x254] ss:$8 sps:$4 sm:$0xff]  }
  0x6b   : > { %1028 = vmatprep.mubr.bf16.mxu0 %v2964_v5  ;;  %1297 = vmatprep.mubr.bf16.mxu1 %v2969_v6  ;;  %v3013_v5 = vld [vmem:[%s3809_s1 + $0x250] ss:$8 sps:$4 sm:$0xff]   ;;  %v3021_v6 = vld [vmem:[%s3809_s1 + $0x264] ss:$8 sps:$4 sm:$0xff]  }
  0x6d   : > { %1050 = vmatpush1.bf16.msra.mxu0 %v2931_v7  ;;  %1319 = vmatpush1.bf16.msra.mxu1 %v2931_v7  ;;  %v3116_v7 = vmov 0  }
  0x6e   : > { %1051 = vmatprep.subr.bf16.mxu0 %v2936_v8  ;;  %1320 = vmatprep.subr.bf16.mxu1 %v2936_v8  ;;  %v3019_v8 = vld [vmem:[%s3809_s1 + $0x260] ss:$8 sps:$4 sm:$0xff]  }
  0x70   : > { %1029 = vmatmul.mubr.bf16.gmra.mrb[4].mxu0 %v2971_v9  ;;  %1298 = vmatmul.mubr.bf16.gmra.mrb[4].mxu1 %v2972_v10  ;;  %v3025_v9 = vld [vmem:[%s3809_s1 + $0x274] ss:$8 sps:$4 sm:$0xff]   ;;  %v3023_v10 = vld [vmem:[%s3809_s1 + $0x270] ss:$8 sps:$4 sm:$0xff]  }
  0x71   : > { %1052 = vmatpush1.bf16.msra.mxu0 %v2934_v13  ;;  %1321 = vmatpush1.bf16.msra.mxu1 %v2934_v13  ;;  %v3117_v13 = vmov 0.0  }
  0x72   : > { %1053 = vmatprep.subr.bf16.mxu0 %v2939_v14  ;;  %1322 = vmatprep.subr.bf16.mxu1 %v2939_v14  ;;  %v3032_v14 = vld [vmem:[%s3811_s3] sm:$0xff]  }
  0x73   : > { %1038 = vmatprep.mubr.bf16.mxu0 %v2352_v15  ;;  %1307 = vmatprep.mubr.bf16.mxu1 %v2462_v16  ;;  %v3033_v15 = vld [vmem:[%s3811_s3 + $0x40] sm:$0xff]   ;;  %v3034_v16 = vld [vmem:[%s3811_s3 + $0x8] sm:$0xff]  }
  0x75   : > { %1054 = vmatpush1.bf16.msra.mxu0 %v2937_v17  ;;  %1323 = vmatpush1.bf16.msra.mxu1 %v2937_v17  ;;  %v3035_v17 = vld [vmem:[%s3811_s3 + $0x48] sm:$0xff]  }
  0x76   : > { %1055 = vmatprep.subr.bf16.mxu0 %v2942_v18  ;;  %1324 = vmatprep.subr.bf16.mxu1 %v2942_v18  ;;  %v3028_v18 = vld [vmem:[%s3309_s21 + $0x38] ss:$20 sps:$4 sm:$0xff]  }
  0x78   : > { %1039 = vmatmul.mubr.bf16.gmra.mrb[8].mxu0 %v2351_v21  ;;  %1308 = vmatmul.mubr.bf16.gmra.mrb[8].mxu1 %v2461_v22  ;;  %v3037_v21 = vld [vmem:[%s3811_s3 + $0x50] sm:$0xff]   ;;  %v3038_v22 = vld [vmem:[%s3811_s3 + $0x18] sm:$0xff]  }
  0x79   : > { %1056 = vmatpush1.bf16.msra.mxu0 %v2940_v19  ;;  %1325 = vmatpush1.bf16.msra.mxu1 %v2940_v19  ;;  %v3029_v19 = vld [vmem:[%s3309_s21 + $0x9c] ss:$20 sps:$4 sm:$0xff]  }
  0x7a   : > { %1057 = vmatprep.subr.bf16.mxu0 %v2945_v20  ;;  %1326 = vmatprep.subr.bf16.mxu1 %v2945_v20  ;;  %v3036_v20 = vld [vmem:[%s3811_s3 + $0x10] sm:$0xff]  }
  0x7b   : > { %1079 = vmatprep.mubr.bf16.mxu0 %v2988_v23  ;;  %1348 = vmatprep.mubr.bf16.mxu1 %v2994_v24  ;;  %v3039_v23 = vld [vmem:[%s3811_s3 + $0x58] sm:$0xff]   ;;  %v3030_v24 = vld [vmem:[%s3309_s21 + $0x60] ss:$0 sps:$4 sm:$0xff]  }
  0x7d   : > { %1058 = vmatpush1.bf16.msra.mxu0 %v2943_v25  ;;  %1327 = vmatpush1.bf16.msra.mxu1 %v2943_v25  ;;  %v3031_v25 = vld [vmem:[%s3309_s21 + $0xc4] ss:$0 sps:$4 sm:$0xff]  }
  0x7e   : > { %1059 = vmatprep.subr.bf16.mxu0 %v2948_v26  ;;  %1328 = vmatprep.subr.bf16.mxu1 %v2948_v26  ;;  %v3040_v26 = vld [vmem:[%s3811_s3 + $0x20] sm:$0xff]  }
  0x81   : > { %1060 = vmatpush1.bf16.msra.mxu0 %v2946_v27  ;;  %1329 = vmatpush1.bf16.msra.mxu1 %v2946_v27  ;;  %v3041_v27 = vld [vmem:[%s3811_s3 + $0x60] sm:$0xff]  }
  0x82   : > { %1061 = vmatprep.subr.bf16.mxu0 %v2951_v28  ;;  %1330 = vmatprep.subr.bf16.mxu1 %v2951_v28  ;;  %v3042_v28 = vld [vmem:[%s3811_s3 + $0x28] sm:$0xff]  }
  0x85   : > { %1062 = vmatpush1.bf16.msra.mxu0 %v2949_v29  ;;  %1331 = vmatpush1.bf16.msra.mxu1 %v2949_v29  ;;  %v3043_v29 = vld [vmem:[%s3811_s3 + $0x68] sm:$0xff]  }
  0x86   : > { %1063 = vmatprep.subr.bf16.mxu0 %v2954_v30  ;;  %1332 = vmatprep.subr.bf16.mxu1 %v2954_v30  ;;  %v3044_v30 = vld [vmem:[%s3811_s3 + $0x30] sm:$0xff]  }
  0x89   : > { %1064 = vmatpush1.bf16.msra.mxu0 %v2952_v31  ;;  %1333 = vmatpush1.bf16.msra.mxu1 %v2952_v31  ;;  %v3045_v31 = vld [vmem:[%s3811_s3 + $0x70] sm:$0xff]  }
  0x8a   : > { %1065 = vmatprep.subr.bf16.mxu0 %v2957_v32  ;;  %1334 = vmatprep.subr.bf16.mxu1 %v2957_v32  ;;  %v3046_v32 = vld [vmem:[%s3811_s3 + $0x38] sm:$0xff]  }
  0x8d   : > { %1066 = vmatpush1.bf16.msra.mxu0 %v2955_v33  ;;  %1335 = vmatpush1.bf16.msra.mxu1 %v2955_v33  ;;  %v3047_v33 = vld [vmem:[%s3811_s3 + $0x78] sm:$0xff]  }
  0x8e   : > { %1067 = vmatprep.subr.bf16.mxu0 %v2960_v34  ;;  %1336 = vmatprep.subr.bf16.mxu1 %v2960_v34 }
  0x91   : > { %1068 = vmatpush1.bf16.msra.mxu0 %v2958_v35  ;;  %1337 = vmatpush1.bf16.msra.mxu1 %v2958_v35 }
  0x92   : > { %1069 = vmatprep.subr.bf16.mxu0 %v2963_v36  ;;  %1338 = vmatprep.subr.bf16.mxu1 %v2963_v36 }
  0x95   : > { %1070 = vmatpush1.bf16.msra.mxu0 %v2961_v37  ;;  %1339 = vmatpush1.bf16.msra.mxu1 %v2961_v37 }
  0x96   : > { %1071 = vmatprep.subr.bf16.mxu0 %v2968_v38  ;;  %1340 = vmatprep.subr.bf16.mxu1 %v2968_v38 }
  0x99   : > { %1072 = vmatpush1.bf16.msra.mxu0 %v2966_v39  ;;  %1341 = vmatpush1.bf16.msra.mxu1 %v2966_v39 }
  0x9a   : > { %1073 = vmatprep.subr.bf16.mxu0 %v2975_v40  ;;  %1342 = vmatprep.subr.bf16.mxu1 %v2975_v40 }
  0x9d   : > { %1074 = vmatpush1.bf16.msra.mxu0 %v2973_v41  ;;  %1343 = vmatpush1.bf16.msra.mxu1 %v2973_v41 }
  0x9e   : > { %1075 = vmatprep.subr.bf16.mxu0 %v2979_v42  ;;  %1344 = vmatprep.subr.bf16.mxu1 %v2979_v42  ;;  %v2466_v42 = vld [vmem:[%s3810_s2] ss:$0 sm:$0xff] }
  0xa1   : > { %1076 = vmatpush1.bf16.msra.mxu0 %v2977_v43  ;;  %1345 = vmatpush1.bf16.msra.mxu1 %v2977_v43 }
  0xa2   : > { %1077 = vmatprep.subr.bf16.mxu0 %v2985_v44  ;;  %1346 = vmatprep.subr.bf16.mxu1 %v2985_v44 }
  0xa5   : > { %1078 = vmatpush1.bf16.msra.mxu0 %v2983_v45  ;;  %1347 = vmatpush1.bf16.msra.mxu1 %v2983_v45 }
  0xa6   : > { %1108 = vmatprep.subr.bf16.mxu0 %v2991_v46  ;;  %1377 = vmatprep.subr.bf16.mxu1 %v2991_v46 }
  0xa8   : > { %1080 = vmatmul.mubr.bf16.vlgmr.msra.gmra.mrb[0].mxu0 %v2986_v47  ;;  %1349 = vmatmul.mubr.bf16.vlgmr.msra.gmra.mrb[0].mxu1 %v2992_v48 }
  0xa9   : > { %1109 = vmatpush1.bf16.msra.mxu0 %v2989_v49  ;;  %1378 = vmatpush1.bf16.msra.mxu1 %v2989_v49 }
  0xaa   : > { %1110 = vmatprep.subr.bf16.mxu0 %v2997_v50  ;;  %1379 = vmatprep.subr.bf16.mxu1 %v2997_v50 }
  0xab   : > { %1089 = vmatprep.mubr.bf16.mxu0 %v3004_v51  ;;  %1358 = vmatprep.mubr.bf16.mxu1 %v3006_v52 }
  0xad   : > { %1111 = vmatpush1.bf16.msra.mxu0 %v2995_v53  ;;  %1380 = vmatpush1.bf16.msra.mxu1 %v2995_v53 }
  0xae   : > { %1112 = vmatprep.subr.bf16.mxu0 %v3000_v54  ;;  %1381 = vmatprep.subr.bf16.mxu1 %v3000_v54 }
  0xb0   : > { %1090 = vmatmul.mubr.bf16.gmra.mrb[4].mxu0 %v3008_v55  ;;  %1359 = vmatmul.mubr.bf16.gmra.mrb[4].mxu1 %v3012_v56 }
  0xb1   : > { %1113 = vmatpush1.bf16.msra.mxu0 %v2998_v59  ;;  %1382 = vmatpush1.bf16.msra.mxu1 %v2998_v59 }
  0xb2   : > { %1114 = vmatprep.subr.bf16.mxu0 %v3003_v60  ;;  %1383 = vmatprep.subr.bf16.mxu1 %v3003_v60 }
  0xb3   : > { %1099 = vmatprep.mubr.bf16.mxu0 %v2354_v61  ;;  %1368 = vmatprep.mubr.bf16.mxu1 %v2464_v62 }
  0xb5   : > { %1115 = vmatpush1.bf16.msra.mxu0 %v3001_v63  ;;  %1384 = vmatpush1.bf16.msra.mxu1 %v3001_v63 }
  0xb6   : > { %1116 = vmatprep.subr.bf16.mxu0 %v3011_v0  ;;  %1385 = vmatprep.subr.bf16.mxu1 %v3011_v0  ;;  %v3048_v0 = vld [vmem:[%s3811_s3 + $0xc0] sm:$0xff]  }
  0xb8   : > { %1100 = vmatmul.mubr.bf16.gmra.mrb[8].mxu0 %v2353_v1  ;;  %1369 = vmatmul.mubr.bf16.gmra.mrb[8].mxu1 %v2463_v2 }
  0xb9   : > { %1117 = vmatpush1.bf16.msra.mxu0 %v3009_v3  ;;  %1386 = vmatpush1.bf16.msra.mxu1 %v3009_v3 }
  0xba   : > { %1118 = vmatprep.subr.bf16.mxu0 %v3015_v4  ;;  %1387 = vmatprep.subr.bf16.mxu1 %v3015_v4  ;;  %v3049_v4 = vld [vmem:[%s3811_s3 + $0x80] sm:$0xff]  }
  0xbb   : > { %1140 = vmatprep.mubr.bf16.mxu0 %v3116_v7  ;;  %1409 = vmatprep.mubr.bf16.mxu1 %v3116_v7 }
  0xbd   : > { %1119 = vmatpush1.bf16.msra.mxu0 %v3013_v5  ;;  %1388 = vmatpush1.bf16.msra.mxu1 %v3013_v5 }
  0xbe   : > { %1120 = vmatprep.subr.bf16.mxu0 %v3021_v6  ;;  %1389 = vmatprep.subr.bf16.mxu1 %v3021_v6 }
  0xc1   : > { %1121 = vmatpush1.bf16.msra.mxu0 %v3019_v8  ;;  %1390 = vmatpush1.bf16.msra.mxu1 %v3019_v8  ;;  %v3050_v8 = vld [vmem:[%s3811_s3 + $0xc8] sm:$0xff]  }
  0xc2   : > { %1122 = vmatprep.subr.bf16.mxu0 %v3025_v9  ;;  %1391 = vmatprep.subr.bf16.mxu1 %v3025_v9 }
  0xc5   : > { %1123 = vmatpush1.bf16.msra.mxu0 %v3023_v10  ;;  %1392 = vmatpush1.bf16.msra.mxu1 %v3023_v10 }
  0xc6   : > { %2675 = vmatprep.subr.bf16.mxu1 %v3117_v13  ;;  %2655 = vmatprep.subr.bf16.mxu0 %v3117_v13 }
  0xc8   : > { %1141 = vmatmul.mubr.bf16.vlgmr.msra.gmra.mrb[0].mxu0 %v3026_v11  ;;  %1410 = vmatmul.mubr.bf16.vlgmr.msra.gmra.mrb[0].mxu1 %v3027_v12 }
  0xc9   : > { %1150 = vmatprep.mubr.bf16.mxu0 %v3116_v7  ;;  %1419 = vmatprep.mubr.bf16.mxu1 %v3116_v7 }
  0xca   : > { %2676 = vmatpush3.bf16.msra.mxu1 %v3032_v14  ;;  %2656 = vmatpush3.bf16.msra.mxu0 %v3033_v15 }
  0xcb   : > { %2677 = vmatprep.subr.bf16.mxu1 %v3117_v13  ;;  %2657 = vmatprep.subr.bf16.mxu0 %v3117_v13 }
  0xce   : > { %2678 = vmatpush3.bf16.msra.mxu1 %v3034_v16  ;;  %2658 = vmatpush3.bf16.msra.mxu0 %v3035_v17  ;;  %v3051_v16 = vld [vmem:[%s3811_s3 + $0x88] sm:$0xff]  }
  0xcf   : > { %2679 = vmatprep.subr.bf16.mxu1 %v3117_v13  ;;  %2659 = vmatprep.subr.bf16.mxu0 %v3117_v13 }
  0xd0   : > { %1151 = vmatmul.mubr.bf16.gmra.mrb[4].mxu0 %v3028_v18  ;;  %1420 = vmatmul.mubr.bf16.gmra.mrb[4].mxu1 %v3029_v19 }
  0xd1   : > { %1160 = vmatprep.mubr.bf16.mxu0 %v3116_v7  ;;  %1429 = vmatprep.mubr.bf16.mxu1 %v3116_v7 }
  0xd2   : > { %2680 = vmatpush3.bf16.msra.mxu1 %v3036_v20  ;;  %2660 = vmatpush3.bf16.msra.mxu0 %v3037_v21 }
  0xd3   : > { %2681 = vmatprep.subr.bf16.mxu1 %v3117_v13  ;;  %2661 = vmatprep.subr.bf16.mxu0 %v3117_v13 }
  0xd6   : > { %2682 = vmatpush3.bf16.msra.mxu1 %v3038_v22  ;;  %2662 = vmatpush3.bf16.msra.mxu0 %v3039_v23 }
  0xd7   : > { %2683 = vmatprep.subr.bf16.mxu1 %v3117_v13  ;;  %2663 = vmatprep.subr.bf16.mxu0 %v3117_v13 }
  0xd8   : > { %1161 = vmatmul.mubr.bf16.gmra.mrb[8].mxu0 %v3030_v24  ;;  %1430 = vmatmul.mubr.bf16.gmra.mrb[8].mxu1 %v3031_v25  ;;  %v3052_v24 = vld [vmem:[%s3811_s3 + $0xd0] sm:$0xff]  }
  0xd9   : > { %2691 = vmatprep.mubr.msk.bf16.mxu1 %vm3118_vm0, %v3117_v13  ;;  %2671 = vmatprep.mubr.msk.bf16.mxu0 %vm3118_vm0, %v3117_v13 }
  0xda   : > { %2684 = vmatpush3.bf16.msra.mxu1 %v3040_v26  ;;  %2664 = vmatpush3.bf16.msra.mxu0 %v3041_v27  ;;  %v3053_v27 = vld [vmem:[%s3811_s3 + $0x90] sm:$0xff]  }
  0xdb   : > { %2685 = vmatprep.subr.bf16.mxu1 %v3117_v13  ;;  %2665 = vmatprep.subr.bf16.mxu0 %v3117_v13 }
  0xde   : > { %2686 = vmatpush3.bf16.msra.mxu1 %v3042_v28  ;;  %2666 = vmatpush3.bf16.msra.mxu0 %v3043_v29  ;;  %v3054_v29 = vld [vmem:[%s3811_s3 + $0xd8] sm:$0xff]  }
  0xdf   : > { %2687 = vmatprep.subr.bf16.mxu1 %v3117_v13  ;;  %2667 = vmatprep.subr.bf16.mxu0 %v3117_v13 }
  0xe2   : > { %2688 = vmatpush3.bf16.msra.mxu1 %v3044_v30  ;;  %2668 = vmatpush3.bf16.msra.mxu0 %v3045_v31  ;;  %v3055_v30 = vld [vmem:[%s3811_s3 + $0x98] sm:$0xff]   ;;  %v3056_v31 = vld [vmem:[%s3811_s3 + $0xe0] sm:$0xff]  }
  0xe3   : > { %2689 = vmatprep.subr.bf16.mxu1 %v3117_v13  ;;  %2669 = vmatprep.subr.bf16.mxu0 %v3117_v13 }
  0xe6   : > { %2690 = vmatpush3.bf16.msra.mxu1 %v3046_v32  ;;  %2670 = vmatpush3.bf16.msra.mxu0 %v3047_v33  ;;  %v3057_v32 = vld [vmem:[%s3811_s3 + $0xa0] sm:$0xff]   ;;  %v3058_v33 = vld [vmem:[%s3811_s3 + $0xe8] sm:$0xff]  }
  0xe7   : > { %2715 = vmatprep.subr.bf16.mxu1 %v3117_v13  ;;  %2695 = vmatprep.subr.bf16.mxu0 %v3117_v13 }
 0x19b   : > { %v1142_v34 = vpop.f32.mrb[0].mxu0  ;;  %v1411_v35 = vpop.f32.mrb[0].mxu1 }
 0x19c   : > { %v1438_v36 = vmax.f32 %v1142_v34, %v1411_v35  ;;  %v1144_v37 = vpop.f32.mrb[1].mxu0  ;;  %v1413_v38 = vpop.f32.mrb[1].mxu1  ;;  %v3059_v34 = vld [vmem:[%s3811_s3 + $0xa8] sm:$0xff]   ;;  %v3060_v35 = vld [vmem:[%s3811_s3 + $0xf0] sm:$0xff]  }
 0x19d   : > { %v1439_v39 = vmax.f32 %v1144_v37, %v1413_v38  ;;  %v1146_v40 = vpop.f32.mrb[2].mxu0  ;;  %v1415_v41 = vpop.f32.mrb[2].mxu1  ;;  %v3062_v37 = vld [vmem:[%s3811_s3 + $0xf8] sm:$0xff]  }
 0x19e   : > { %v1440_v43 = vmax.f32 %v1146_v40, %v1415_v41  ;;  %v1148_v44 = vpop.f32.mrb[3].mxu0  ;;  %v1417_v45 = vpop.f32.mrb[3].mxu1  ;;  %v3063_v38 = vld [vmem:[%s3811_s3 + $0xb8] sm:$0xff]   ;;  %v3064_v40 = vld [vmem:[%s3811_s3 + $0x100] sm:$0xff]   ;;  %v3065_v41 = vld [vmem:[%s3811_s3 + $0x108] sm:$0xff]  }
 0x19f   : > { %v1448_v46 = vmax.f32 %v1438_v36, %v1439_v39  ;;  %v1441_v47 = vmax.f32 %v1148_v44, %v1417_v45  ;;  %v3061_v36 = vld [vmem:[%s3811_s3 + $0xb0] sm:$0xff]   ;;  %v3068_v44 = vld [vmem:[%s3811_s3 + $0x120] sm:$0xff]   ;;  %v3069_v45 = vld [vmem:[%s3811_s3 + $0x128] sm:$0xff]  }
 0x1a1   : > { %v1460_v48 = vadd.f32 %v2466_v42, %v1448_v46  ;;  %v1449_v49 = vmax.f32 %v1440_v43, %v1441_v47  ;;  %v3067_v43 = vld [vmem:[%s3811_s3 + $0x118] sm:$0xff]   ;;  %v3070_v46 = vld [vmem:[%s3811_s3 + $0x130] sm:$0xff]  }
 0x1a2   : > { %v3071_v47 = vld [vmem:[%s3811_s3 + $0x138] sm:$0xff]  }
 0x1a3   : > { %v1461_v50 = vadd.f32 %v2466_v42, %v1449_v49  ;;  %v1152_v51 = vpop.f32.mrb[4].mxu0  ;;  %v1421_v52 = vpop.f32.mrb[4].mxu1  ;;  %v1465_v56 = vmax.f32 %v1460_v48, 0.0 }
 0x1a4   : > { %v1442_v53 = vmax.f32 %v1152_v51, %v1421_v52  ;;  %v1154_v54 = vpop.f32.mrb[5].mxu0  ;;  %v1423_v55 = vpop.f32.mrb[5].mxu1  ;;  %v3073_v51 = vld [vmem:[%s3813_s5 + $0x8] sm:$0xff]   ;;  %v3074_v52 = vld [vmem:[%s3813_s5 + $0x10] sm:$0xff]  }
 0x1a5   : > { %v1466_v57 = vmax.f32 %v1461_v50, 0.0  ;;  %v1443_v58 = vmax.f32 %v1154_v54, %v1423_v55  ;;  %v1156_v59 = vpop.f32.mrb[6].mxu0  ;;  %v1425_v60 = vpop.f32.mrb[6].mxu1  ;;  %v3072_v50 = vld [vmem:[%s3813_s5] sm:$0xff]   ;;  %v3077_v55 = vld [vmem:[%s3813_s5 + $0x28] sm:$0xff]  }
 0x1a6   : > { %v1444_v61 = vmax.f32 %v1156_v59, %v1425_v60  ;;  %v1158_v62 = vpop.f32.mrb[7].mxu0  ;;  %v1427_v63 = vpop.f32.mrb[7].mxu1  ;;  %v3076_v54 = vld [vmem:[%s3813_s5 + $0x20] sm:$0xff]   ;;  %v3081_v59 = vld [vmem:[%s3815_s7 + $0x8] sm:$0xff]   ;;  %v3082_v60 = vld [vmem:[%s3815_s7 + $0x10] sm:$0xff]  }
 0x1a7   : > { %v1470_v1 = vpack.c.bf16 %v1466_v57, %v1465_v56  ;;  %v1450_v2 = vmax.f32 %v1442_v53, %v1443_v58  ;;  %v1445_v3 = vmax.f32 %v1158_v62, %v1427_v63  ;;  %v3075_v53 = vld [vmem:[%s3813_s5 + $0x18] sm:$0xff]   ;;  %v3078_v56 = vld [vmem:[%s3813_s5 + $0x30] sm:$0xff]   ;;  %v3080_v58 = vld [vmem:[%s3815_s7] sm:$0xff]  }
 0x1a8   : > { %v3079_v57 = vld [vmem:[%s3813_s5 + $0x38] sm:$0xff]   ;;  %v3084_v62 = vld [vmem:[%s3815_s7 + $0x20] sm:$0xff]   ;;  %v3085_v63 = vld [vmem:[%s3815_s7 + $0x28] sm:$0xff]  }
 0x1a9   : > { %v1507_v5 = vrot.slane %v1470_v1, 4  ;;  %v1462_v6 = vadd.f32 %v2466_v42, %v1450_v2  ;;  %v1451_v7 = vmax.f32 %v1444_v61, %v1445_v3  ;;  %2692 = vmatmul.mubr.bf16.vlgmr.msra.gmra.mrb[12].mxu1 %v1470_v1  ;;  %v3083_v61 = vld [vmem:[%s3815_s7 + $0x18] sm:$0xff]  }
 0x1aa   : > { %2716 = vmatpush3.bf16.msra.mxu1 %v3048_v0  ;;  %2731 = vmatprep.mubr.msk.bf16.mxu1 %vm3118_vm0, %v3117_v13 }
 0x1ab   : > { %v1463_v9 = vadd.f32 %v2466_v42, %v1451_v7  ;;  %v1162_v10 = vpop.f32.mrb[8].mxu0  ;;  %v1431_v11 = vpop.f32.mrb[8].mxu1  ;;  %2672 = vmatmul.mubr.bf16.vlgmr.msra.gmra.mrb[12].mxu0 %v1507_v5  ;;  %2717 = vmatprep.subr.bf16.mxu1 %v3117_v13  ;;  %v1467_v17 = vmax.f32 %v1462_v6, 0.0 }
 0x1ac   : > { %v1446_v12 = vmax.f32 %v1162_v10, %v1431_v11  ;;  %2696 = vmatpush3.bf16.msra.mxu0 %v3049_v4  ;;  %v1164_v14 = vpop.f32.mrb[9].mxu0  ;;  %v1433_v15 = vpop.f32.mrb[9].mxu1  ;;  %2711 = vmatprep.mubr.msk.bf16.mxu0 %vm3118_vm0, %v3117_v13 }
 0x1ad   : > { %v1468_v18 = vmax.f32 %v1463_v9, 0.0  ;;  %v1447_v19 = vmax.f32 %v1164_v14, %v1433_v15  ;;  %v1166_v20 = vpop.f32.mrb[10].mxu0  ;;  %v1435_v21 = vpop.f32.mrb[10].mxu1  ;;  %2697 = vmatprep.subr.bf16.mxu0 %v3117_v13 }
 0x1ae   : > { %2718 = vmatpush3.bf16.msra.mxu1 %v3050_v8  ;;  %v1167_v22 = vpop.f32.mrb[11].mxu0  ;;  %v1436_v23 = vpop.f32.mrb[11].mxu1  ;;  %v2571_v21 = vld [vmem:[%s3812_s4] ss:$0 sm:$0xff] }
 0x1af   : > { %v1471_v25 = vpack.c.bf16 %v1468_v18, %v1467_v17  ;;  %v1452_v26 = vmax.f32 %v1446_v12, %v1447_v19  ;;  %2719 = vmatprep.subr.bf16.mxu1 %v3117_v13 }
 0x1b0   : > { %2698 = vmatpush3.bf16.msra.mxu0 %v3051_v16 }
 0x1b1   : > { %v3636_v28 = vadd.f32 %v2466_v42, %v1452_v26  ;;  %2699 = vmatprep.subr.bf16.mxu0 %v3117_v13  ;;  %v1809_v39 = vrot.slane %v1471_v25, 4  ;;  %v3066_v42 = vld [vmem:[%s3811_s3 + $0x110] sm:$0xff]  }
 0x1b2   : > { %2720 = vmatpush3.bf16.msra.mxu1 %v3052_v24 }
 0x1b3   : > { %2721 = vmatprep.subr.bf16.mxu1 %v3117_v13  ;;  %v1469_v48 = vmax.f32 %v3636_v28, 0.0 }
 0x1b4   : > { %2700 = vmatpush3.bf16.msra.mxu0 %v3053_v27 }
 0x1b5   : > { %2701 = vmatprep.subr.bf16.mxu0 %v3117_v13  ;;  %v1472_v49 = vpack.c.bf16 %v1469_v48, %v1469_v48 }
 0x1b6   : > { %2722 = vmatpush3.bf16.msra.mxu1 %v3054_v29  ;;  %v3086_v29 = vld [vmem:[%s3815_s7 + $0x30] sm:$0xff]  }
 0x1b7   : > { %2723 = vmatprep.subr.bf16.mxu1 %v3117_v13 }
 0x1b8   : > { %2702 = vmatpush3.bf16.msra.mxu0 %v3055_v30  ;;  %v3087_v30 = vld [vmem:[%s3815_s7 + $0x38] sm:$0xff]  }
 0x1b9   : > { %2703 = vmatprep.subr.bf16.mxu0 %v3117_v13 }
 0x1ba   : > { %2724 = vmatpush3.bf16.msra.mxu1 %v3056_v31  ;;  %v2572_v31 = vld [vmem:[%s3814_s6] ss:$0 sm:$0xff] }
 0x1bb   : > { %2725 = vmatprep.subr.bf16.mxu1 %v3117_v13 }
 0x1bc   : > { %2704 = vmatpush3.bf16.msra.mxu0 %v3057_v32 }
 0x1bd   : > { %2705 = vmatprep.subr.bf16.mxu0 %v3117_v13 }
 0x1be   : > { %2726 = vmatpush3.bf16.msra.mxu1 %v3058_v33 }
 0x1bf   : > { %2727 = vmatprep.subr.bf16.mxu1 %v3117_v13 }
 0x1c0   : > { %2706 = vmatpush3.bf16.msra.mxu0 %v3059_v34 }
 0x1c1   : > { %2707 = vmatprep.subr.bf16.mxu0 %v3117_v13 }
 0x1c2   : > { %2728 = vmatpush3.bf16.msra.mxu1 %v3060_v35 }
 0x1c3   : > { %2729 = vmatprep.subr.bf16.mxu1 %v3117_v13 }
 0x1c4   : > { %2708 = vmatpush3.bf16.msra.mxu0 %v3061_v36 }
 0x1c5   : > { %2709 = vmatprep.subr.bf16.mxu0 %v3117_v13 }
 0x1c6   : > { %2730 = vmatpush3.bf16.msra.mxu1 %v3062_v37 }
 0x1c7   : > { %2755 = vmatprep.subr.bf16.mxu1 %v3117_v13 }
 0x1c8   : > { %2710 = vmatpush3.bf16.msra.mxu0 %v3063_v38 }
 0x1c9   : > { %2732 = vmatmul.mubr.bf16.vlgmr.msra.gmra.mrb[16].mxu1 %v1809_v39  ;;  %2735 = vmatprep.subr.bf16.mxu0 %v3117_v13 }
 0x1ca   : > { %2771 = vmatprep.mubr.msk.bf16.mxu1 %vm3118_vm0, %v3117_v13  ;;  %2756 = vmatpush3.bf16.msra.mxu1 %v3072_v50 }
 0x1cb   : > { %2712 = vmatmul.mubr.bf16.vlgmr.msra.gmra.mrb[16].mxu0 %v1471_v25  ;;  %2757 = vmatprep.subr.bf16.mxu1 %v3117_v13 }
 0x1cc   : > { %2736 = vmatpush3.bf16.msra.mxu0 %v3064_v40  ;;  %2751 = vmatprep.mubr.msk.bf16.mxu0 %vm3118_vm0, %v3117_v13 }
 0x1cd   : > { %2737 = vmatprep.subr.bf16.mxu0 %v3117_v13 }
 0x1ce   : > { %2758 = vmatpush3.bf16.msra.mxu1 %v3073_v51 }
 0x1cf   : > { %2759 = vmatprep.subr.bf16.mxu1 %v3117_v13 }
 0x1d0   : > { %2738 = vmatpush3.bf16.msra.mxu0 %v3065_v41 }
 0x1d1   : > { %2739 = vmatprep.subr.bf16.mxu0 %v3117_v13 }
 0x1d2   : > { %2760 = vmatpush3.bf16.msra.mxu1 %v3074_v52 }
 0x1d3   : > { %2761 = vmatprep.subr.bf16.mxu1 %v3117_v13 }
 0x1d4   : > { %2740 = vmatpush3.bf16.msra.mxu0 %v3066_v42 }
 0x1d5   : > { %2741 = vmatprep.subr.bf16.mxu0 %v3117_v13 }
 0x1d6   : > { %2762 = vmatpush3.bf16.msra.mxu1 %v3075_v53 }
 0x1d7   : > { %2763 = vmatprep.subr.bf16.mxu1 %v3117_v13 }
 0x1d8   : > { %2742 = vmatpush3.bf16.msra.mxu0 %v3067_v43 }
 0x1d9   : > { %2743 = vmatprep.subr.bf16.mxu0 %v3117_v13 }
 0x1da   : > { %2764 = vmatpush3.bf16.msra.mxu1 %v3076_v54 }
 0x1db   : > { %2765 = vmatprep.subr.bf16.mxu1 %v3117_v13 }
 0x1dc   : > { %2744 = vmatpush3.bf16.msra.mxu0 %v3068_v44 }
 0x1dd   : > { %2745 = vmatprep.subr.bf16.mxu0 %v3117_v13 }
 0x1de   : > { %2766 = vmatpush3.bf16.msra.mxu1 %v3077_v55 }
 0x1df   : > { %2767 = vmatprep.subr.bf16.mxu1 %v3117_v13 }
 0x1e0   : > { %2746 = vmatpush3.bf16.msra.mxu0 %v3069_v45 }
 0x1e1   : > { %2747 = vmatprep.subr.bf16.mxu0 %v3117_v13 }
 0x1e2   : > { %2768 = vmatpush3.bf16.msra.mxu1 %v3078_v56 }
 0x1e3   : > { %2769 = vmatprep.subr.bf16.mxu1 %v3117_v13 }
 0x1e4   : > { %2748 = vmatpush3.bf16.msra.mxu0 %v3070_v46 }
 0x1e5   : > { %2749 = vmatprep.subr.bf16.mxu0 %v3117_v13 }
 0x1e6   : > { %2770 = vmatpush3.bf16.msra.mxu1 %v3079_v57 }
 0x1e8   : > { %2750 = vmatpush3.bf16.msra.mxu0 %v3071_v47 }
 0x1e9   : > { %2775 = vmatprep.subr.bf16.mxu0 %v3117_v13 }
 0x1eb   : > { %2752 = vmatmul.mubr.bf16.vlgmr.msra.gmra.mrb[20].mxu0 %v1472_v49 }
 0x1ec   : > { %2791 = vmatprep.mubr.msk.bf16.mxu0 %vm3118_vm0, %v3117_v13  ;;  %2776 = vmatpush3.bf16.msra.mxu0 %v3080_v58 }
 0x1ed   : > { %2777 = vmatprep.subr.bf16.mxu0 %v3117_v13 }
 0x1f0   : > { %2778 = vmatpush3.bf16.msra.mxu0 %v3081_v59 }
 0x1f1   : > { %2779 = vmatprep.subr.bf16.mxu0 %v3117_v13 }
 0x1f4   : > { %2780 = vmatpush3.bf16.msra.mxu0 %v3082_v60 }
 0x1f5   : > { %2781 = vmatprep.subr.bf16.mxu0 %v3117_v13 }
 0x1f8   : > { %2782 = vmatpush3.bf16.msra.mxu0 %v3083_v61 }
 0x1f9   : > { %2783 = vmatprep.subr.bf16.mxu0 %v3117_v13 }
 0x1fc   : > { %2784 = vmatpush3.bf16.msra.mxu0 %v3084_v62 }
 0x1fd   : > { %2785 = vmatprep.subr.bf16.mxu0 %v3117_v13 }
 0x200   : > { %2786 = vmatpush3.bf16.msra.mxu0 %v3085_v63 }
 0x201   : > { %2787 = vmatprep.subr.bf16.mxu0 %v3117_v13 }
 0x204   : > { %2788 = vmatpush3.bf16.msra.mxu0 %v3086_v29 }
 0x205   : > { %2789 = vmatprep.subr.bf16.mxu0 %v3117_v13  ;;  %v2581_v13 = vld [vmem:[%s3816_s8] ss:$0 sm:$0xff] }
 0x208   : > { %2790 = vmatpush3.bf16.msra.mxu0 %v3087_v30 }
 0x27c   : > { %v1679_v0 = vpop.f32.mrb[12].mxu1 }
 0x27d   : > { %v2693_v1 = vpop.f32.mrb[13].mxu1 }
 0x27e   : > { %v1591_v2 = vpop.f32.mrb[12].mxu0  ;;  %v1682_v3 = vpop.f32.mrb[14].mxu1 }
 0x27f   : > { %v1680_v4 = vadd.f32 %v1679_v0, %v1591_v2  ;;  %v2673_v5 = vpop.f32.mrb[13].mxu0  ;;  %v2694_v6 = vpop.f32.mrb[15].mxu1 }
 0x280   : > { %v1594_v7 = vpop.f32.mrb[14].mxu0 }
 0x281   : > { %v2674_v8 = vpop.f32.mrb[15].mxu0 }
 0x29c   : > { %v1893_v9 = vpop.f32.mrb[16].mxu1 }
 0x29d   : > { %v2733_v10 = vpop.f32.mrb[17].mxu1 }
 0x29e   : > { %v1784_v11 = vpop.f32.mrb[16].mxu0  ;;  %v1896_v12 = vpop.f32.mrb[18].mxu1 }
 0x29f   : > { %v1790_v14 = vadd.f32 %v1784_v11, %v1680_v4  ;;  %v2713_v15 = vpop.f32.mrb[17].mxu0  ;;  %v2734_v16 = vpop.f32.mrb[19].mxu1 }
 0x2a0   : > { %v1787_v17 = vpop.f32.mrb[18].mxu0 }
 0x2a1   : > { %v2714_v18 = vpop.f32.mrb[19].mxu0  ;;  %v1899_v19 = vadd.f32 %v1893_v9, %v1790_v14 }
 0x2be   : > { %v1999_v20 = vpop.f32.mrb[20].mxu0 }
 0x2bf   : > { %v2005_v22 = vadd.f32 %v1999_v20, %v1899_v19  ;;  %v2753_v23 = vpop.f32.mrb[21].mxu0 }
 0x2c0   : > { %v2002_v24 = vpop.f32.mrb[22].mxu0 }
 0x2c1   : > { %v2013_v25 = vadd.f32 %v2571_v21, %v2005_v22  ;;  %v2754_v26 = vpop.f32.mrb[23].mxu0 }
 0x2c3   : > { %v2014_v27 = vmax.f32 %v2013_v25, 0.0 }
 0x2c5   : > { %v2015_v28 = vpack.c.bf16 %v2014_v27, %v2014_v27 }
 0x2c7   : > { %2772 = vmatmul.mubr.bf16.vlgmr.msra.gmra.mrb[20].mxu1 %v2015_v28 }
 0x39a   : > { %v2121_v32 = vpop.f32.mrb[20].mxu1 }
 0x39b   : > { %v2122_v33 = vadd.f32 %v2572_v31, %v2121_v32  ;;  %v2773_v34 = vpop.f32.mrb[21].mxu1 }
 0x39c   : > { %v2124_v35 = vpop.f32.mrb[22].mxu1 }
 0x39d   : > { %v2127_v36 = vmax.f32 %v2122_v33, 0.0  ;;  %v2774_v37 = vpop.f32.mrb[23].mxu1 }
 0x39f   : > { %v2128_v38 = vpack.c.bf16 %v2127_v36, %v2127_v36 }
 0x3a1   : > { %2792 = vmatmul.mubr.bf16.vlgmr.msra.gmra.mrb[24].mxu0 %v2128_v38 }
 0x474   : > { %v2234_v39 = vpop.f32.mrb[24].mxu0 }
 0x475   : > { %v2235_v40 = vadd.f32 %v2581_v13, %v2234_v39  ;;  %v2793_v41 = vpop.f32.mrb[25].mxu0 }
 0x476   : > { %v2237_v42 = vpop.f32.mrb[26].mxu0 }
 0x477   : > { %2240 = vmax.xlane.f32.xlu0 %v2235_v40  ;;  %v2794_v43 = vpop.f32.mrb[27].mxu0 }
 0x504   : > { %v2241_v44 = vpop.xlane.xlu0 %2240 }
 0x505   : > { %v2242_v45 = vsub.f32 %v2235_v40, %v2241_v44 }
 0x507   : > { %v2243_v46 = vmul.f32 1.442695, %v2242_v45 }
 0x509   : > { %3088 = vpow2.f32 %v2243_v46 }
 0x513   : > { %v3089_v47 = vpop.eup %3088 }
 0x514   : > { %2245 = vadd.xlane.f32.xlu0 %v3089_v47 }
 0x5a1   : > { %v2246_v48 = vpop.xlane.xlu0 %2245 }
 0x5a2   : > { %3090 = vlog2.f32 %v2246_v48 }
 0x5ac   : > { %v3091_v49 = vpop.eup %3090 }
 0x5ad   : > { %v2248_v50 = vmul.f32 0.6931472, %v3091_v49 }
 0x5af   : > { %v2249_v51 = vsub.f32 %v2242_v45, %v2248_v50 }
 0x5b1   : > { %2250 = vst [vmem:[%s419_s17] sm:$0xff] %v2249_v51 }
 0x5b2 PF: > { %p16_p9 = scmp.ge.s32.totalorder %s3186_s13, 4   ;;  %s3818_s30 = smov %s3110_s10 }
 0x5b3   : > { %s3819_s10 = smov %s3195_s16  ;;  %s3820_s11 = smov %s3186_s13 }
 0x5b4   :  { %18 = sbr.rel (!%p16_p9) target bundleno = 2 (0x2), region = 128 }

</bundles_post_ra>
